<compile_context>
chip_gen: v7x
topology: tpu7x:2x2x1
jax: 0.10.0
libtpu: 0.0.40
codegen_flags: <defaults>
</compile_context>

<pallas_src>
import math
import functools

import jax
import jax.numpy as jnp
from jax.experimental import pallas as pl
from jax.experimental.pallas import tpu as pltpu

LN_EPS = 1e-6


# --------------------------------------------------------------------------
# Kernel
# --------------------------------------------------------------------------
def decoder_block_kernel(x_ref, ctx_ref, w_ref, w2_ref, v_ref, out_ref,
                         *, C, K, MLP, SUB):
    """Natural-layout (T, H) token blocks in/out; channel-major (H, T) math
    inside (tokens on the 128-lane axis).

    w_ref  : (8H + MLP, H) bf16 weight slab (block-diagonal, pre-transposed):
             [0,3H)=sa qkv | [3H,4H)=sa out | [4H,5H)=ca q | [5H,7H)=ca kv |
             [7H,8H)=ca out | [8H,8H+MLP)=mlp W1^T
    w2_ref : (H, MLP) bf16  (mlp W2^T)
    v_ref  : (max(H,MLP), 16) f32 column slab:
             0..5 LN1/2/3 w,b | 6..8 sa q/k/v bias | 9 sa out bias |
             10..12 ca q/k/v bias | 13 ca out bias | 14 mlp b2 | 15 mlp b1
    """
    H = C * K
    f32 = jnp.float32
    bf16 = jnp.bfloat16
    scale = 1.0 / math.sqrt(K)

    def col(i):                                  # (H, 1) broadcast column
        return v_ref[0:H, i:i + 1]

    def layernorm(v, wi, bi):                    # features live on sublanes
        mu = jnp.mean(v, axis=0, keepdims=True)
        d = v - mu
        var = jnp.mean(d * d, axis=0, keepdims=True)
        return d * jax.lax.rsqrt(var + LN_EPS) * col(wi) + col(bi)

    def gelu_tanh(v):
        # tanh-approximate GELU: tanh lands on the (nearly idle) EUP slot
        # instead of the long erf VPU polynomial on the saturating VALU.
        # Deviates from torch.nn.GELU()'s exact erf by <~1e-3 absolute, well
        # inside the bf16-matmul tolerance checked in __main__.
        c0 = math.sqrt(2.0 / math.pi)
        return 0.5 * v * (1.0 + jnp.tanh(c0 * (v + 0.044715 * v * v * v)))

    def mm(w_rows, act):                         # bf16 x bf16 -> f32 accumulate
        return jnp.dot(w_rows, act.astype(bf16), preferred_element_type=f32)

    def criss_cross(q_t, k_t, v_t):
        # q_t is already pre-scaled by 1/sqrt(K).  Per-token softmax over the
        # KEY-channel axis; contraction over the QUERY-channel axis (matches
        # torch einsum 'ijklm,ijkl->ijkm').  Two bounded loops keep the vreg
        # live set small: 128/256-lane sub-tiles x query-channel iterations,
        # so the full (C, C, K, T) score/exp/attn tensors are never
        # materialized (no spills even at large token tiles).
        # NOTE(v6e/v7x): the elementwise math below could run in bf16 (packed
        # 16x128 vregs, ~2x VALU) keeping den/reciprocal in f32; kept f32
        # here so v5e (no bf16 VPU) and accuracy are unaffected.
        T = q_t.shape[-1]
        ts = math.gcd(T, min(SUB, T))            # static sub-tile size
        pieces = []
        for s0 in range(0, T, ts):
            qr = q_t[:, s0:s0 + ts].reshape(C, K, ts)
            kr = k_t[:, s0:s0 + ts].reshape(C, K, ts)
            vr = v_t[:, s0:s0 + ts].reshape(C, K, ts)
            acc = jnp.zeros((C, K, ts), f32)
            for i in range(C):                   # query-channel loop
                si = qr[i][None] * kr            # (C, K, ts): si[j] = q_i * k_j
                mi = jnp.max(si, axis=0, keepdims=True)
                ei = jnp.exp(si - mi)
                den = jnp.sum(ei, axis=0, keepdims=True)[0]        # (K, ts)
                # fold 1/den into v_i (den is indexed by the query channel i,
                # same as v_i) -> no (C,C,K,T)-sized normalization multiply.
                vi = vr[i] * pl.reciprocal(den, approx=True)
                acc = acc + ei * vi[None]        # ctx[j] += attn[i, j] * v_i
            pieces.append(acc.reshape(H, ts))
        return pieces[0] if len(pieces) == 1 else jnp.concatenate(pieces, -1)

    # ---- load natural-layout tiles, transpose on the XLU (idle slot) ----
    x = jnp.transpose(x_ref[...])                        # (H, T) f32
    ctx_tok = jnp.transpose(ctx_ref[...])                # (H, T) raw context

    # ---- ln_1 + criss-cross SELF attention (fused block-diag qkv) ----
    a = layernorm(x, 0, 1)
    qkv = mm(w_ref[0:3 * H, :], a)                       # (3H, T)
    q = (qkv[0:H] + col(6)) * scale                      # pre-scale q once
    k = qkv[H:2 * H] + col(7)
    v = qkv[2 * H:3 * H] + col(8)
    cc = criss_cross(q, k, v)
    sa_out = mm(w_ref[3 * H:4 * H, :], cc) + col(9)
    r1 = a + sa_out                                      # dropout = identity

    # ---- ln_2 + criss-cross CROSS attention (k, v from raw context) ----
    b = layernorm(r1, 2, 3)
    q = (mm(w_ref[4 * H:5 * H, :], b) + col(10)) * scale
    kv = mm(w_ref[5 * H:7 * H, :], ctx_tok)              # (2H, T)
    k = kv[0:H] + col(11)
    v = kv[H:2 * H] + col(12)
    cc = criss_cross(q, k, v)
    ca = mm(w_ref[7 * H:8 * H, :], cc) + col(13)

    # ---- ln_3 + MLP; final residual is on the cross-attention output ----
    y = layernorm(ca, 4, 5)
    h = mm(w_ref[8 * H:8 * H + MLP, :], y) + v_ref[0:MLP, 15:16]
    h = gelu_tanh(h)
    y2 = mm(w2_ref[...], h) + col(14)

    # store natural-layout (T, H): no wrapper-side output transpose pass
    out_ref[...] = jnp.transpose(ca + y2).astype(out_ref.dtype)


# --------------------------------------------------------------------------
# Parameter packing (wrapper-side, one-time layout plumbing)
# --------------------------------------------------------------------------
def pack_decoder_params(p, *, C, K, mlp_dim):
    # NOTE: the dense block-diagonal fused QKV is (C-1)/C zeros; it is free
    # while H <= the MXU contraction depth (128 v5e / 256 v6e,v7x).  For much
    # larger H, split the projections per channel-group instead.
    H = C * K
    bd = jax.scipy.linalg.block_diag

    sa = p["sa_wqkv"]                                     # (H, 3K), rows = fan_in
    q_bd = bd(*[sa[c * K:(c + 1) * K, 0:K].T for c in range(C)])
    k_bd = bd(*[sa[c * K:(c + 1) * K, K:2 * K].T for c in range(C)])
    v_bd = bd(*[sa[c * K:(c + 1) * K, 2 * K:3 * K].T for c in range(C)])
    sa_qkv_t = jnp.concatenate([q_bd, k_bd, v_bd], axis=0)        # (3H, H)
    sa_wo_t = bd(*([p["sa_wo"].T] * C))                           # (H, H)

    ca_q_t = bd(*[p["ca_wq"][c * K:(c + 1) * K, :].T for c in range(C)])
    ca_k_t = bd(*[p["ca_wkv"][c * K:(c + 1) * K, 0:K].T for c in range(C)])
    ca_v_t = bd(*[p["ca_wkv"][c * K:(c + 1) * K, K:2 * K].T for c in range(C)])
    ca_kv_t = jnp.concatenate([ca_k_t, ca_v_t], axis=0)           # (2H, H)
    ca_wo_t = bd(*([p["ca_wo"].T] * C))                           # (H, H)

    w1_t = p["mlp_w1"].T                                          # (MLP, H)
    w_slab = jnp.concatenate(
        [sa_qkv_t, sa_wo_t, ca_q_t, ca_kv_t, ca_wo_t, w1_t],
        axis=0).astype(jnp.bfloat16)                              # (8H+MLP, H)
    w2_t = p["mlp_w2"].T.astype(jnp.bfloat16)                     # (H, MLP)

    P = max(H, mlp_dim)
    cols = []

    def add_h(vec):
        cols.append(jnp.pad(jnp.reshape(vec, (H,)), (0, P - H)))

    add_h(p["ln1_w"]); add_h(p["ln1_b"])
    add_h(p["ln2_w"]); add_h(p["ln2_b"])
    add_h(p["ln3_w"]); add_h(p["ln3_b"])
    add_h(p["sa_bqkv"][:, 0:K])                  # q bias  (channel-major flat)
    add_h(p["sa_bqkv"][:, K:2 * K])              # k bias
    add_h(p["sa_bqkv"][:, 2 * K:3 * K])          # v bias
    add_h(jnp.tile(p["sa_bo"].reshape(K), (C,)))
    add_h(p["ca_bq"])
    add_h(p["ca_bkv"][:, 0:K])
    add_h(p["ca_bkv"][:, K:2 * K])
    add_h(jnp.tile(p["ca_bo"].reshape(K), (C,)))
    add_h(p["mlp_b2"])
    cols.append(jnp.pad(jnp.reshape(p["mlp_b1"], (mlp_dim,)), (0, P - mlp_dim)))
    vec_slab = jnp.stack(cols, axis=1).astype(jnp.float32)        # (P, 16)
    return w_slab, w2_t, vec_slab


# --------------------------------------------------------------------------
# Wrapper
# --------------------------------------------------------------------------
def decoder_block_forward(x, context, params, *, C, K, mlp_dim,
                          tile_tokens=1024, softmax_subtile=256):
    B, L, H = x.shape
    assert H == C * K
    # Layout fast path: one channel == one sublane group (reshape (H,T)->(C,K,T)
    # and weight-slab row slices stay sublane-aligned).  Other K values would
    # still be numerically correct but introduce layout copies/masked accesses.
    assert K == 8, "kernel layout fast path assumes k_factor == 8"
    M = B * L
    w_slab, w2_t, vec_slab = pack_decoder_params(params, C=C, K=K, mlp_dim=mlp_dim)

    # Natural token-major layout straight from/to HBM; no wrapper-side
    # transposes (each would add a full HBM read+write pass of an (M, H)
    # activation to a memory-bound kernel).  In-kernel XLU transposes instead.
    x2 = x.reshape(M, H)
    c2 = context.reshape(M, H)

    Tc = min(tile_tokens, M)
    assert M % Tc == 0, "B*L must be a multiple of the token tile"
    # v7x: per-step VMEM is only a few hundred KiB (well under the 32 MiB
    # scoped budget) -- no need to shrink Tc; the useful lever at large M is
    # M // Tc >= 2 so the "parallel" grid axis feeds both TensorCores.

    tok_spec = pl.BlockSpec((Tc, H), lambda i: (i, 0))

    def full_spec(a):
        nd = a.ndim
        return pl.BlockSpec(a.shape, lambda i, _nd=nd: (0,) * _nd)

    out2 = pl.pallas_call(
        functools.partial(decoder_block_kernel, C=C, K=K, MLP=mlp_dim,
                          SUB=softmax_subtile),
        out_shape=jax.ShapeDtypeStruct((M, H), jnp.float32),
        grid=(M // Tc,),
        in_specs=[tok_spec, tok_spec,
                  full_spec(w_slab), full_spec(w2_t), full_spec(vec_slab)],
        out_specs=tok_spec,
        compiler_params=pltpu.CompilerParams(
            dimension_semantics=("parallel",)),
    )(x2, c2, w_slab, w2_t, vec_slab)
    return out2.reshape(B, L, H)


# --------------------------------------------------------------------------
# Synthetic parameters + pure-JAX reference (mirrors the PyTorch module)
# --------------------------------------------------------------------------
def init_params(key, C, K, mlp_dim):
    """Per-channel Linear weights stacked along rows: channel c = rows [c*K,(c+1)*K).
    Weights stored pre-transposed (fan_in, fan_out); biases as 2-D rows."""
    H = C * K
    keys = iter(jax.random.split(key, 20))

    def uni(k, shape, fan_in):
        lim = 1.0 / math.sqrt(fan_in)
        return jax.random.uniform(k, shape, jnp.float32, -lim, lim)

    p = {}
    for name in ("ln1", "ln2", "ln3"):
        p[f"{name}_w"] = 1.0 + 0.05 * jax.random.normal(next(keys), (1, H), jnp.float32)
        p[f"{name}_b"] = 0.05 * jax.random.normal(next(keys), (1, H), jnp.float32)
    p["sa_wqkv"] = uni(next(keys), (C * K, 3 * K), K)
    p["sa_bqkv"] = uni(next(keys), (C, 3 * K), K)
    p["sa_wo"] = uni(next(keys), (K, K), K)
    p["sa_bo"] = uni(next(keys), (1, K), K)
    p["ca_wq"] = uni(next(keys), (C * K, K), K)
    p["ca_bq"] = uni(next(keys), (C, K), K)
    p["ca_wkv"] = uni(next(keys), (C * K, 2 * K), K)
    p["ca_bkv"] = uni(next(keys), (C, 2 * K), K)
    p["ca_wo"] = uni(next(keys), (K, K), K)
    p["ca_bo"] = uni(next(keys), (1, K), K)
    p["mlp_w1"] = uni(next(keys), (H, mlp_dim), H)
    p["mlp_b1"] = 1e-3 * jax.random.normal(next(keys), (1, mlp_dim), jnp.float32)
    p["mlp_w2"] = uni(next(keys), (mlp_dim, H), mlp_dim)
    p["mlp_b2"] = 1e-3 * jax.random.normal(next(keys), (1, H), jnp.float32)
    return p


def torch_style_reference(x, context, p, C, K):
    """Pure-JAX mirror of the PyTorch DecoderBlock.forward (eval mode, exact erf GELU)."""
    B, L, H = x.shape

    def layernorm(v, w, b):
        mu = v.mean(-1, keepdims=True)
        var = ((v - mu) ** 2).mean(-1, keepdims=True)
        return (v - mu) / jnp.sqrt(var + LN_EPS) * w.reshape(-1) + b.reshape(-1)

    def cc_core(qs, ks, vs, wo, bo):
        q = jnp.stack(qs, -1)                                      # (B,L,K,C)
        k = jnp.stack(ks, -1)
        v = jnp.stack(vs, -1)
        scores = q[..., :, None] * k[..., None, :] / math.sqrt(K)  # (B,L,K,C,C)
        attn = jax.nn.softmax(scores, axis=-1)
        ctxv = jnp.einsum("blkcm,blkc->blkm", attn, v)             # (B,L,K,C)
        ctxv = jnp.swapaxes(ctxv, -2, -1)                          # (B,L,C,K)
        out = ctxv @ wo + bo.reshape(-1)
        return out.reshape(B, L, C * K)

    def cc_self(xin):
        qs, ks, vs = [], [], []
        for c in range(C):
            qkv = xin[..., c * K:(c + 1) * K] @ p["sa_wqkv"][c * K:(c + 1) * K, :] \
                  + p["sa_bqkv"][c]
            qs.append(qkv[..., :K]); ks.append(qkv[..., K:2 * K]); vs.append(qkv[..., 2 * K:])
        return cc_core(qs, ks, vs, p["sa_wo"], p["sa_bo"])

    def cc_cross(xin, ctxin):
        qs, ks, vs = [], [], []
        for c in range(C):
            q = xin[..., c * K:(c + 1) * K] @ p["ca_wq"][c * K:(c + 1) * K, :] + p["ca_bq"][c]
            kv = ctxin[..., c * K:(c + 1) * K] @ p["ca_wkv"][c * K:(c + 1) * K, :] + p["ca_bkv"][c]
            qs.append(q); ks.append(kv[..., :K]); vs.append(kv[..., K:])
        return cc_core(qs, ks, vs, p["ca_wo"], p["ca_bo"])

    a = layernorm(x, p["ln1_w"], p["ln1_b"])
    r1 = a + cc_self(a)
    b = layernorm(r1, p["ln2_w"], p["ln2_b"])
    ca = cc_cross(b, context)
    y = layernorm(ca, p["ln3_w"], p["ln3_b"])
    h = y @ p["mlp_w1"] + p["mlp_b1"].reshape(-1)
    h = 0.5 * h * (1.0 + jax.lax.erf(h / math.sqrt(2.0)))
    y2 = h @ p["mlp_w2"] + p["mlp_b2"].reshape(-1)
    return ca + y2


if __name__ == "__main__":
    # hidden_dim = in_channels * k_factor, as the module's chunking implies.
    B, L, C, K, MLP_DIM = 2, 8, 4, 8, 64
    H = C * K

    key = jax.random.PRNGKey(0)
    kx, kc, kp = jax.random.split(key, 3)
    x = jax.random.normal(kx, (B, L, H), jnp.float32)
    context = jax.random.normal(kc, (B, L, H), jnp.float32)
    params = init_params(kp, C, K, MLP_DIM)

    # TODO(synk): dropout layers are treated as identity (inference mode).
    out = decoder_block_forward(x, context, params, C=C, K=K, mlp_dim=MLP_DIM)
    out = jax.block_until_ready(out)

    # High-precision reference (kernel uses bf16 MXU inputs, approx reciprocal
    # in the softmax and tanh-approx GELU -> loosened tolerance below).
    with jax.default_matmul_precision("highest"):
        ref = jax.block_until_ready(torch_style_reference(x, context, params, C, K))

    assert out.shape == (B, L, H)
    max_err = float(jnp.max(jnp.abs(out - ref)))
    ref_scale = float(jnp.max(jnp.abs(ref)))
    tol = 2.5e-2 * ref_scale + 1e-3   # bf16 multiply / f32 accumulate tolerance
    assert max_err < tol, f"kernel/reference mismatch: max abs err {max_err} >= {tol}"

    print("KERNEL_OK")
</pallas_src>

<mosaic_0001>
module attributes {stable_mosaic.version = 11 : i64} {
  func.func @decoder_block_kernel(%arg0: i32, %arg1: memref<16x32xf32, #tpu.memory_space<vmem>>, %arg2: memref<16x32xf32, #tpu.memory_space<vmem>>, %arg3: memref<320x32xbf16, #tpu.memory_space<vmem>>, %arg4: memref<32x64xbf16, #tpu.memory_space<vmem>>, %arg5: memref<64x16xf32, #tpu.memory_space<vmem>>, %arg6: memref<16x32xf32, #tpu.memory_space<vmem>>) attributes {dimension_semantics = [#tpu.dimension_semantics<parallel>], iteration_bounds = array<i64: 1>, scalar_prefetch = 0 : i64, scratch_operands = 0 : i64, tpu.core_type = #tpu.core_type<tc>, window_params = [{transform_indices = @transform_0, window_bounds = array<i64: 16, 32>}, {transform_indices = @transform_1, window_bounds = array<i64: 16, 32>}, {pipeline_mode = #tpu.pipeline_mode<synchronous>, transform_indices = @transform_2, window_bounds = array<i64: 320, 32>}, {pipeline_mode = #tpu.pipeline_mode<synchronous>, transform_indices = @transform_3, window_bounds = array<i64: 32, 64>}, {pipeline_mode = #tpu.pipeline_mode<synchronous>, transform_indices = @transform_4, window_bounds = array<i64: 64, 16>}, {transform_indices = @transform_5, window_bounds = array<i64: 16, 32>}]} {
    %c0 = arith.constant 0 : index
    %c0_0 = arith.constant 0 : index
    %0 = vector.load %arg1[%c0, %c0_0] : memref<16x32xf32, #tpu.memory_space<vmem>>, vector<16x32xf32>
    %1 = tpu.transpose %0, [1, 0] : vector<16x32xf32> -> vector<32x16xf32>
    %c0_1 = arith.constant 0 : index
    %c0_2 = arith.constant 0 : index
    %2 = vector.load %arg2[%c0_1, %c0_2] : memref<16x32xf32, #tpu.memory_space<vmem>>, vector<16x32xf32>
    %3 = tpu.transpose %2, [1, 0] : vector<16x32xf32> -> vector<32x16xf32>
    %cst = arith.constant dense<0.000000e+00> : vector<16xf32>
    %4 = vector.multi_reduction <add>, %1, %cst [0] : vector<32x16xf32> to vector<16xf32>
    %5 = vector.shape_cast %4 : vector<16xf32> to vector<1x16xf32>
    %cst_3 = arith.constant 3.200000e+01 : f32
    %6 = vector.broadcast %cst_3 : f32 to vector<1x16xf32>
    %7 = arith.divf %5, %6 : vector<1x16xf32>
    %8 = vector.broadcast %7 : vector<1x16xf32> to vector<32x16xf32>
    %9 = arith.subf %1, %8 : vector<32x16xf32>
    %10 = arith.mulf %9, %9 : vector<32x16xf32>
    %cst_4 = arith.constant dense<0.000000e+00> : vector<16xf32>
    %11 = vector.multi_reduction <add>, %10, %cst_4 [0] : vector<32x16xf32> to vector<16xf32>
    %12 = vector.shape_cast %11 : vector<16xf32> to vector<1x16xf32>
    %cst_5 = arith.constant 3.200000e+01 : f32
    %13 = vector.broadcast %cst_5 : f32 to vector<1x16xf32>
    %14 = arith.divf %12, %13 : vector<1x16xf32>
    %cst_6 = arith.constant 9.99999997E-7 : f32
    %15 = vector.broadcast %cst_6 : f32 to vector<1x16xf32>
    %16 = arith.addf %14, %15 : vector<1x16xf32>
    %17 = math.rsqrt %16 : vector<1x16xf32>
    %18 = vector.broadcast %17 : vector<1x16xf32> to vector<32x16xf32>
    %19 = arith.mulf %9, %18 : vector<32x16xf32>
    %c0_7 = arith.constant 0 : index
    %c0_8 = arith.constant 0 : index
    %20 = vector.load %arg5[%c0_7, %c0_8] : memref<64x16xf32, #tpu.memory_space<vmem>>, vector<32x1xf32>
    %21 = vector.broadcast %20 : vector<32x1xf32> to vector<32x16xf32>
    %22 = arith.mulf %19, %21 : vector<32x16xf32>
    %c0_9 = arith.constant 0 : index
    %c1 = arith.constant 1 : index
    %23 = vector.load %arg5[%c0_9, %c1] : memref<64x16xf32, #tpu.memory_space<vmem>>, vector<32x1xf32>
    %24 = vector.broadcast %23 : vector<32x1xf32> to vector<32x16xf32>
    %25 = arith.addf %22, %24 : vector<32x16xf32>
    %c0_10 = arith.constant 0 : index
    %c0_11 = arith.constant 0 : index
    %26 = vector.load %arg3[%c0_10, %c0_11] : memref<320x32xbf16, #tpu.memory_space<vmem>>, vector<96x32xbf16>
    %27 = arith.truncf %25 : vector<32x16xf32> to vector<32x16xbf16>
    %cst_12 = arith.constant dense<0.000000e+00> : vector<96x16xf32>
    %28 = tpu.matmul %26, %27, %cst_12 {dimension_numbers = #tpu.dot_dimension_numbers<[1], [0], [0], [1], [0, 0, 1, 1], [], []>} : vector<96x32xbf16>, vector<32x16xbf16>, vector<96x16xf32> -> vector<96x16xf32>
    %29 = vector.extract_strided_slice %28 {offsets = [0, 0], sizes = [32, 16], strides = [1, 1]} : vector<96x16xf32> to vector<32x16xf32>
    %c0_13 = arith.constant 0 : index
    %c6 = arith.constant 6 : index
    %30 = vector.load %arg5[%c0_13, %c6] : memref<64x16xf32, #tpu.memory_space<vmem>>, vector<32x1xf32>
    %31 = vector.broadcast %30 : vector<32x1xf32> to vector<32x16xf32>
    %32 = arith.addf %29, %31 : vector<32x16xf32>
    %cst_14 = arith.constant 0.353553385 : f32
    %33 = vector.broadcast %cst_14 : f32 to vector<32x16xf32>
    %34 = arith.mulf %32, %33 : vector<32x16xf32>
    %35 = vector.extract_strided_slice %28 {offsets = [32, 0], sizes = [32, 16], strides = [1, 1]} : vector<96x16xf32> to vector<32x16xf32>
    %c0_15 = arith.constant 0 : index
    %c7 = arith.constant 7 : index
    %36 = vector.load %arg5[%c0_15, %c7] : memref<64x16xf32, #tpu.memory_space<vmem>>, vector<32x1xf32>
    %37 = vector.broadcast %36 : vector<32x1xf32> to vector<32x16xf32>
    %38 = arith.addf %35, %37 : vector<32x16xf32>
    %39 = vector.extract_strided_slice %28 {offsets = [64, 0], sizes = [32, 16], strides = [1, 1]} : vector<96x16xf32> to vector<32x16xf32>
    %c0_16 = arith.constant 0 : index
    %c8 = arith.constant 8 : index
    %40 = vector.load %arg5[%c0_16, %c8] : memref<64x16xf32, #tpu.memory_space<vmem>>, vector<32x1xf32>
    %41 = vector.broadcast %40 : vector<32x1xf32> to vector<32x16xf32>
    %42 = arith.addf %39, %41 : vector<32x16xf32>
    %43 = vector.shape_cast %34 : vector<32x16xf32> to vector<4x8x16xf32>
    %44 = vector.shape_cast %38 : vector<32x16xf32> to vector<4x8x16xf32>
    %45 = vector.shape_cast %42 : vector<32x16xf32> to vector<4x8x16xf32>
    %cst_17 = arith.constant 0.000000e+00 : f32
    %46 = vector.broadcast %cst_17 : f32 to vector<4x8x16xf32>
    %47 = vector.extract_strided_slice %43 {offsets = [0, 0, 0], sizes = [1, 8, 16], strides = [1, 1, 1]} : vector<4x8x16xf32> to vector<1x8x16xf32>
    %48 = vector.shape_cast %47 : vector<1x8x16xf32> to vector<8x16xf32>
    %49 = vector.shape_cast %48 : vector<8x16xf32> to vector<1x8x16xf32>
    %50 = vector.broadcast %49 : vector<1x8x16xf32> to vector<4x8x16xf32>
    %51 = arith.mulf %50, %44 : vector<4x8x16xf32>
    %cst_18 = arith.constant dense<0xFF800000> : vector<8x16xf32>
    %52 = vector.multi_reduction <maximumf>, %51, %cst_18 [0] : vector<4x8x16xf32> to vector<8x16xf32>
    %53 = vector.shape_cast %52 : vector<8x16xf32> to vector<1x8x16xf32>
    %54 = vector.broadcast %53 : vector<1x8x16xf32> to vector<4x8x16xf32>
    %55 = arith.subf %51, %54 : vector<4x8x16xf32>
    %56 = math.exp %55 : vector<4x8x16xf32>
    %cst_19 = arith.constant dense<0.000000e+00> : vector<8x16xf32>
    %57 = vector.multi_reduction <add>, %56, %cst_19 [0] : vector<4x8x16xf32> to vector<8x16xf32>
    %58 = vector.shape_cast %57 : vector<8x16xf32> to vector<1x8x16xf32>
    %59 = vector.shape_cast %58 : vector<1x8x16xf32> to vector<8x16xf32>
    %60 = vector.extract_strided_slice %45 {offsets = [0, 0, 0], sizes = [1, 8, 16], strides = [1, 1, 1]} : vector<4x8x16xf32> to vector<1x8x16xf32>
    %61 = vector.shape_cast %60 : vector<1x8x16xf32> to vector<8x16xf32>
    %62 = tpu.reciprocal %59 {approx = true} : vector<8x16xf32> -> vector<8x16xf32>
    %63 = arith.mulf %61, %62 : vector<8x16xf32>
    %64 = vector.shape_cast %63 : vector<8x16xf32> to vector<1x8x16xf32>
    %65 = vector.broadcast %64 : vector<1x8x16xf32> to vector<4x8x16xf32>
    %66 = arith.mulf %56, %65 : vector<4x8x16xf32>
    %67 = arith.addf %46, %66 : vector<4x8x16xf32>
    %68 = vector.extract_strided_slice %43 {offsets = [1, 0, 0], sizes = [1, 8, 16], strides = [1, 1, 1]} : vector<4x8x16xf32> to vector<1x8x16xf32>
    %69 = vector.shape_cast %68 : vector<1x8x16xf32> to vector<8x16xf32>
    %70 = vector.shape_cast %69 : vector<8x16xf32> to vector<1x8x16xf32>
    %71 = vector.broadcast %70 : vector<1x8x16xf32> to vector<4x8x16xf32>
    %72 = arith.mulf %71, %44 : vector<4x8x16xf32>
    %cst_20 = arith.constant dense<0xFF800000> : vector<8x16xf32>
    %73 = vector.multi_reduction <maximumf>, %72, %cst_20 [0] : vector<4x8x16xf32> to vector<8x16xf32>
    %74 = vector.shape_cast %73 : vector<8x16xf32> to vector<1x8x16xf32>
    %75 = vector.broadcast %74 : vector<1x8x16xf32> to vector<4x8x16xf32>
    %76 = arith.subf %72, %75 : vector<4x8x16xf32>
    %77 = math.exp %76 : vector<4x8x16xf32>
    %cst_21 = arith.constant dense<0.000000e+00> : vector<8x16xf32>
    %78 = vector.multi_reduction <add>, %77, %cst_21 [0] : vector<4x8x16xf32> to vector<8x16xf32>
    %79 = vector.shape_cast %78 : vector<8x16xf32> to vector<1x8x16xf32>
    %80 = vector.shape_cast %79 : vector<1x8x16xf32> to vector<8x16xf32>
    %81 = vector.extract_strided_slice %45 {offsets = [1, 0, 0], sizes = [1, 8, 16], strides = [1, 1, 1]} : vector<4x8x16xf32> to vector<1x8x16xf32>
    %82 = vector.shape_cast %81 : vector<1x8x16xf32> to vector<8x16xf32>
    %83 = tpu.reciprocal %80 {approx = true} : vector<8x16xf32> -> vector<8x16xf32>
    %84 = arith.mulf %82, %83 : vector<8x16xf32>
    %85 = vector.shape_cast %84 : vector<8x16xf32> to vector<1x8x16xf32>
    %86 = vector.broadcast %85 : vector<1x8x16xf32> to vector<4x8x16xf32>
    %87 = arith.mulf %77, %86 : vector<4x8x16xf32>
    %88 = arith.addf %67, %87 : vector<4x8x16xf32>
    %89 = vector.extract_strided_slice %43 {offsets = [2, 0, 0], sizes = [1, 8, 16], strides = [1, 1, 1]} : vector<4x8x16xf32> to vector<1x8x16xf32>
    %90 = vector.shape_cast %89 : vector<1x8x16xf32> to vector<8x16xf32>
    %91 = vector.shape_cast %90 : vector<8x16xf32> to vector<1x8x16xf32>
    %92 = vector.broadcast %91 : vector<1x8x16xf32> to vector<4x8x16xf32>
    %93 = arith.mulf %92, %44 : vector<4x8x16xf32>
    %cst_22 = arith.constant dense<0xFF800000> : vector<8x16xf32>
    %94 = vector.multi_reduction <maximumf>, %93, %cst_22 [0] : vector<4x8x16xf32> to vector<8x16xf32>
    %95 = vector.shape_cast %94 : vector<8x16xf32> to vector<1x8x16xf32>
    %96 = vector.broadcast %95 : vector<1x8x16xf32> to vector<4x8x16xf32>
    %97 = arith.subf %93, %96 : vector<4x8x16xf32>
    %98 = math.exp %97 : vector<4x8x16xf32>
    %cst_23 = arith.constant dense<0.000000e+00> : vector<8x16xf32>
    %99 = vector.multi_reduction <add>, %98, %cst_23 [0] : vector<4x8x16xf32> to vector<8x16xf32>
    %100 = vector.shape_cast %99 : vector<8x16xf32> to vector<1x8x16xf32>
    %101 = vector.shape_cast %100 : vector<1x8x16xf32> to vector<8x16xf32>
    %102 = vector.extract_strided_slice %45 {offsets = [2, 0, 0], sizes = [1, 8, 16], strides = [1, 1, 1]} : vector<4x8x16xf32> to vector<1x8x16xf32>
    %103 = vector.shape_cast %102 : vector<1x8x16xf32> to vector<8x16xf32>
    %104 = tpu.reciprocal %101 {approx = true} : vector<8x16xf32> -> vector<8x16xf32>
    %105 = arith.mulf %103, %104 : vector<8x16xf32>
    %106 = vector.shape_cast %105 : vector<8x16xf32> to vector<1x8x16xf32>
    %107 = vector.broadcast %106 : vector<1x8x16xf32> to vector<4x8x16xf32>
    %108 = arith.mulf %98, %107 : vector<4x8x16xf32>
    %109 = arith.addf %88, %108 : vector<4x8x16xf32>
    %110 = vector.extract_strided_slice %43 {offsets = [3, 0, 0], sizes = [1, 8, 16], strides = [1, 1, 1]} : vector<4x8x16xf32> to vector<1x8x16xf32>
    %111 = vector.shape_cast %110 : vector<1x8x16xf32> to vector<8x16xf32>
    %112 = vector.shape_cast %111 : vector<8x16xf32> to vector<1x8x16xf32>
    %113 = vector.broadcast %112 : vector<1x8x16xf32> to vector<4x8x16xf32>
    %114 = arith.mulf %113, %44 : vector<4x8x16xf32>
    %cst_24 = arith.constant dense<0xFF800000> : vector<8x16xf32>
    %115 = vector.multi_reduction <maximumf>, %114, %cst_24 [0] : vector<4x8x16xf32> to vector<8x16xf32>
    %116 = vector.shape_cast %115 : vector<8x16xf32> to vector<1x8x16xf32>
    %117 = vector.broadcast %116 : vector<1x8x16xf32> to vector<4x8x16xf32>
    %118 = arith.subf %114, %117 : vector<4x8x16xf32>
    %119 = math.exp %118 : vector<4x8x16xf32>
    %cst_25 = arith.constant dense<0.000000e+00> : vector<8x16xf32>
    %120 = vector.multi_reduction <add>, %119, %cst_25 [0] : vector<4x8x16xf32> to vector<8x16xf32>
    %121 = vector.shape_cast %120 : vector<8x16xf32> to vector<1x8x16xf32>
    %122 = vector.shape_cast %121 : vector<1x8x16xf32> to vector<8x16xf32>
    %123 = vector.extract_strided_slice %45 {offsets = [3, 0, 0], sizes = [1, 8, 16], strides = [1, 1, 1]} : vector<4x8x16xf32> to vector<1x8x16xf32>
    %124 = vector.shape_cast %123 : vector<1x8x16xf32> to vector<8x16xf32>
    %125 = tpu.reciprocal %122 {approx = true} : vector<8x16xf32> -> vector<8x16xf32>
    %126 = arith.mulf %124, %125 : vector<8x16xf32>
    %127 = vector.shape_cast %126 : vector<8x16xf32> to vector<1x8x16xf32>
    %128 = vector.broadcast %127 : vector<1x8x16xf32> to vector<4x8x16xf32>
    %129 = arith.mulf %119, %128 : vector<4x8x16xf32>
    %130 = arith.addf %109, %129 : vector<4x8x16xf32>
    %131 = vector.shape_cast %130 : vector<4x8x16xf32> to vector<32x16xf32>
    %c96 = arith.constant 96 : index
    %c0_26 = arith.constant 0 : index
    %132 = vector.load %arg3[%c96, %c0_26] : memref<320x32xbf16, #tpu.memory_space<vmem>>, vector<32x32xbf16>
    %133 = arith.truncf %131 : vector<32x16xf32> to vector<32x16xbf16>
    %cst_27 = arith.constant dense<0.000000e+00> : vector<32x16xf32>
    %134 = tpu.matmul %132, %133, %cst_27 {dimension_numbers = #tpu.dot_dimension_numbers<[1], [0], [0], [1], [0, 0, 1, 1], [], []>} : vector<32x32xbf16>, vector<32x16xbf16>, vector<32x16xf32> -> vector<32x16xf32>
    %c0_28 = arith.constant 0 : index
    %c9 = arith.constant 9 : index
    %135 = vector.load %arg5[%c0_28, %c9] : memref<64x16xf32, #tpu.memory_space<vmem>>, vector<32x1xf32>
    %136 = vector.broadcast %135 : vector<32x1xf32> to vector<32x16xf32>
    %137 = arith.addf %134, %136 : vector<32x16xf32>
    %138 = arith.addf %25, %137 : vector<32x16xf32>
    %cst_29 = arith.constant dense<0.000000e+00> : vector<16xf32>
    %139 = vector.multi_reduction <add>, %138, %cst_29 [0] : vector<32x16xf32> to vector<16xf32>
    %140 = vector.shape_cast %139 : vector<16xf32> to vector<1x16xf32>
    %cst_30 = arith.constant 3.200000e+01 : f32
    %141 = vector.broadcast %cst_30 : f32 to vector<1x16xf32>
    %142 = arith.divf %140, %141 : vector<1x16xf32>
    %143 = vector.broadcast %142 : vector<1x16xf32> to vector<32x16xf32>
    %144 = arith.subf %138, %143 : vector<32x16xf32>
    %145 = arith.mulf %144, %144 : vector<32x16xf32>
    %cst_31 = arith.constant dense<0.000000e+00> : vector<16xf32>
    %146 = vector.multi_reduction <add>, %145, %cst_31 [0] : vector<32x16xf32> to vector<16xf32>
    %147 = vector.shape_cast %146 : vector<16xf32> to vector<1x16xf32>
    %cst_32 = arith.constant 3.200000e+01 : f32
    %148 = vector.broadcast %cst_32 : f32 to vector<1x16xf32>
    %149 = arith.divf %147, %148 : vector<1x16xf32>
    %cst_33 = arith.constant 9.99999997E-7 : f32
    %150 = vector.broadcast %cst_33 : f32 to vector<1x16xf32>
    %151 = arith.addf %149, %150 : vector<1x16xf32>
    %152 = math.rsqrt %151 : vector<1x16xf32>
    %153 = vector.broadcast %152 : vector<1x16xf32> to vector<32x16xf32>
    %154 = arith.mulf %144, %153 : vector<32x16xf32>
    %c0_34 = arith.constant 0 : index
    %c2 = arith.constant 2 : index
    %155 = vector.load %arg5[%c0_34, %c2] : memref<64x16xf32, #tpu.memory_space<vmem>>, vector<32x1xf32>
    %156 = vector.broadcast %155 : vector<32x1xf32> to vector<32x16xf32>
    %157 = arith.mulf %154, %156 : vector<32x16xf32>
    %c0_35 = arith.constant 0 : index
    %c3 = arith.constant 3 : index
    %158 = vector.load %arg5[%c0_35, %c3] : memref<64x16xf32, #tpu.memory_space<vmem>>, vector<32x1xf32>
    %159 = vector.broadcast %158 : vector<32x1xf32> to vector<32x16xf32>
    %160 = arith.addf %157, %159 : vector<32x16xf32>
    %c128 = arith.constant 128 : index
    %c0_36 = arith.constant 0 : index
    %161 = vector.load %arg3[%c128, %c0_36] : memref<320x32xbf16, #tpu.memory_space<vmem>>, vector<32x32xbf16>
    %162 = arith.truncf %160 : vector<32x16xf32> to vector<32x16xbf16>
    %cst_37 = arith.constant dense<0.000000e+00> : vector<32x16xf32>
    %163 = tpu.matmul %161, %162, %cst_37 {dimension_numbers = #tpu.dot_dimension_numbers<[1], [0], [0], [1], [0, 0, 1, 1], [], []>} : vector<32x32xbf16>, vector<32x16xbf16>, vector<32x16xf32> -> vector<32x16xf32>
    %c0_38 = arith.constant 0 : index
    %c10 = arith.constant 10 : index
    %164 = vector.load %arg5[%c0_38, %c10] : memref<64x16xf32, #tpu.memory_space<vmem>>, vector<32x1xf32>
    %165 = vector.broadcast %164 : vector<32x1xf32> to vector<32x16xf32>
    %166 = arith.addf %163, %165 : vector<32x16xf32>
    %cst_39 = arith.constant 0.353553385 : f32
    %167 = vector.broadcast %cst_39 : f32 to vector<32x16xf32>
    %168 = arith.mulf %166, %167 : vector<32x16xf32>
    %c160 = arith.constant 160 : index
    %c0_40 = arith.constant 0 : index
    %169 = vector.load %arg3[%c160, %c0_40] : memref<320x32xbf16, #tpu.memory_space<vmem>>, vector<64x32xbf16>
    %170 = arith.truncf %3 : vector<32x16xf32> to vector<32x16xbf16>
    %cst_41 = arith.constant dense<0.000000e+00> : vector<64x16xf32>
    %171 = tpu.matmul %169, %170, %cst_41 {dimension_numbers = #tpu.dot_dimension_numbers<[1], [0], [0], [1], [0, 0, 1, 1], [], []>} : vector<64x32xbf16>, vector<32x16xbf16>, vector<64x16xf32> -> vector<64x16xf32>
    %172 = vector.extract_strided_slice %171 {offsets = [0, 0], sizes = [32, 16], strides = [1, 1]} : vector<64x16xf32> to vector<32x16xf32>
    %c0_42 = arith.constant 0 : index
    %c11 = arith.constant 11 : index
    %173 = vector.load %arg5[%c0_42, %c11] : memref<64x16xf32, #tpu.memory_space<vmem>>, vector<32x1xf32>
    %174 = vector.broadcast %173 : vector<32x1xf32> to vector<32x16xf32>
    %175 = arith.addf %172, %174 : vector<32x16xf32>
    %176 = vector.extract_strided_slice %171 {offsets = [32, 0], sizes = [32, 16], strides = [1, 1]} : vector<64x16xf32> to vector<32x16xf32>
    %c0_43 = arith.constant 0 : index
    %c12 = arith.constant 12 : index
    %177 = vector.load %arg5[%c0_43, %c12] : memref<64x16xf32, #tpu.memory_space<vmem>>, vector<32x1xf32>
    %178 = vector.broadcast %177 : vector<32x1xf32> to vector<32x16xf32>
    %179 = arith.addf %176, %178 : vector<32x16xf32>
    %180 = vector.shape_cast %168 : vector<32x16xf32> to vector<4x8x16xf32>
    %181 = vector.shape_cast %175 : vector<32x16xf32> to vector<4x8x16xf32>
    %182 = vector.shape_cast %179 : vector<32x16xf32> to vector<4x8x16xf32>
    %cst_44 = arith.constant 0.000000e+00 : f32
    %183 = vector.broadcast %cst_44 : f32 to vector<4x8x16xf32>
    %184 = vector.extract_strided_slice %180 {offsets = [0, 0, 0], sizes = [1, 8, 16], strides = [1, 1, 1]} : vector<4x8x16xf32> to vector<1x8x16xf32>
    %185 = vector.shape_cast %184 : vector<1x8x16xf32> to vector<8x16xf32>
    %186 = vector.shape_cast %185 : vector<8x16xf32> to vector<1x8x16xf32>
    %187 = vector.broadcast %186 : vector<1x8x16xf32> to vector<4x8x16xf32>
    %188 = arith.mulf %187, %181 : vector<4x8x16xf32>
    %cst_45 = arith.constant dense<0xFF800000> : vector<8x16xf32>
    %189 = vector.multi_reduction <maximumf>, %188, %cst_45 [0] : vector<4x8x16xf32> to vector<8x16xf32>
    %190 = vector.shape_cast %189 : vector<8x16xf32> to vector<1x8x16xf32>
    %191 = vector.broadcast %190 : vector<1x8x16xf32> to vector<4x8x16xf32>
    %192 = arith.subf %188, %191 : vector<4x8x16xf32>
    %193 = math.exp %192 : vector<4x8x16xf32>
    %cst_46 = arith.constant dense<0.000000e+00> : vector<8x16xf32>
    %194 = vector.multi_reduction <add>, %193, %cst_46 [0] : vector<4x8x16xf32> to vector<8x16xf32>
    %195 = vector.shape_cast %194 : vector<8x16xf32> to vector<1x8x16xf32>
    %196 = vector.shape_cast %195 : vector<1x8x16xf32> to vector<8x16xf32>
    %197 = vector.extract_strided_slice %182 {offsets = [0, 0, 0], sizes = [1, 8, 16], strides = [1, 1, 1]} : vector<4x8x16xf32> to vector<1x8x16xf32>
    %198 = vector.shape_cast %197 : vector<1x8x16xf32> to vector<8x16xf32>
    %199 = tpu.reciprocal %196 {approx = true} : vector<8x16xf32> -> vector<8x16xf32>
    %200 = arith.mulf %198, %199 : vector<8x16xf32>
    %201 = vector.shape_cast %200 : vector<8x16xf32> to vector<1x8x16xf32>
    %202 = vector.broadcast %201 : vector<1x8x16xf32> to vector<4x8x16xf32>
    %203 = arith.mulf %193, %202 : vector<4x8x16xf32>
    %204 = arith.addf %183, %203 : vector<4x8x16xf32>
    %205 = vector.extract_strided_slice %180 {offsets = [1, 0, 0], sizes = [1, 8, 16], strides = [1, 1, 1]} : vector<4x8x16xf32> to vector<1x8x16xf32>
    %206 = vector.shape_cast %205 : vector<1x8x16xf32> to vector<8x16xf32>
    %207 = vector.shape_cast %206 : vector<8x16xf32> to vector<1x8x16xf32>
    %208 = vector.broadcast %207 : vector<1x8x16xf32> to vector<4x8x16xf32>
    %209 = arith.mulf %208, %181 : vector<4x8x16xf32>
    %cst_47 = arith.constant dense<0xFF800000> : vector<8x16xf32>
    %210 = vector.multi_reduction <maximumf>, %209, %cst_47 [0] : vector<4x8x16xf32> to vector<8x16xf32>
    %211 = vector.shape_cast %210 : vector<8x16xf32> to vector<1x8x16xf32>
    %212 = vector.broadcast %211 : vector<1x8x16xf32> to vector<4x8x16xf32>
    %213 = arith.subf %209, %212 : vector<4x8x16xf32>
    %214 = math.exp %213 : vector<4x8x16xf32>
    %cst_48 = arith.constant dense<0.000000e+00> : vector<8x16xf32>
    %215 = vector.multi_reduction <add>, %214, %cst_48 [0] : vector<4x8x16xf32> to vector<8x16xf32>
    %216 = vector.shape_cast %215 : vector<8x16xf32> to vector<1x8x16xf32>
    %217 = vector.shape_cast %216 : vector<1x8x16xf32> to vector<8x16xf32>
    %218 = vector.extract_strided_slice %182 {offsets = [1, 0, 0], sizes = [1, 8, 16], strides = [1, 1, 1]} : vector<4x8x16xf32> to vector<1x8x16xf32>
    %219 = vector.shape_cast %218 : vector<1x8x16xf32> to vector<8x16xf32>
    %220 = tpu.reciprocal %217 {approx = true} : vector<8x16xf32> -> vector<8x16xf32>
    %221 = arith.mulf %219, %220 : vector<8x16xf32>
    %222 = vector.shape_cast %221 : vector<8x16xf32> to vector<1x8x16xf32>
    %223 = vector.broadcast %222 : vector<1x8x16xf32> to vector<4x8x16xf32>
    %224 = arith.mulf %214, %223 : vector<4x8x16xf32>
    %225 = arith.addf %204, %224 : vector<4x8x16xf32>
    %226 = vector.extract_strided_slice %180 {offsets = [2, 0, 0], sizes = [1, 8, 16], strides = [1, 1, 1]} : vector<4x8x16xf32> to vector<1x8x16xf32>
    %227 = vector.shape_cast %226 : vector<1x8x16xf32> to vector<8x16xf32>
    %228 = vector.shape_cast %227 : vector<8x16xf32> to vector<1x8x16xf32>
    %229 = vector.broadcast %228 : vector<1x8x16xf32> to vector<4x8x16xf32>
    %230 = arith.mulf %229, %181 : vector<4x8x16xf32>
    %cst_49 = arith.constant dense<0xFF800000> : vector<8x16xf32>
    %231 = vector.multi_reduction <maximumf>, %230, %cst_49 [0] : vector<4x8x16xf32> to vector<8x16xf32>
    %232 = vector.shape_cast %231 : vector<8x16xf32> to vector<1x8x16xf32>
    %233 = vector.broadcast %232 : vector<1x8x16xf32> to vector<4x8x16xf32>
    %234 = arith.subf %230, %233 : vector<4x8x16xf32>
    %235 = math.exp %234 : vector<4x8x16xf32>
    %cst_50 = arith.constant dense<0.000000e+00> : vector<8x16xf32>
    %236 = vector.multi_reduction <add>, %235, %cst_50 [0] : vector<4x8x16xf32> to vector<8x16xf32>
    %237 = vector.shape_cast %236 : vector<8x16xf32> to vector<1x8x16xf32>
    %238 = vector.shape_cast %237 : vector<1x8x16xf32> to vector<8x16xf32>
    %239 = vector.extract_strided_slice %182 {offsets = [2, 0, 0], sizes = [1, 8, 16], strides = [1, 1, 1]} : vector<4x8x16xf32> to vector<1x8x16xf32>
    %240 = vector.shape_cast %239 : vector<1x8x16xf32> to vector<8x16xf32>
    %241 = tpu.reciprocal %238 {approx = true} : vector<8x16xf32> -> vector<8x16xf32>
    %242 = arith.mulf %240, %241 : vector<8x16xf32>
    %243 = vector.shape_cast %242 : vector<8x16xf32> to vector<1x8x16xf32>
    %244 = vector.broadcast %243 : vector<1x8x16xf32> to vector<4x8x16xf32>
    %245 = arith.mulf %235, %244 : vector<4x8x16xf32>
    %246 = arith.addf %225, %245 : vector<4x8x16xf32>
    %247 = vector.extract_strided_slice %180 {offsets = [3, 0, 0], sizes = [1, 8, 16], strides = [1, 1, 1]} : vector<4x8x16xf32> to vector<1x8x16xf32>
    %248 = vector.shape_cast %247 : vector<1x8x16xf32> to vector<8x16xf32>
    %249 = vector.shape_cast %248 : vector<8x16xf32> to vector<1x8x16xf32>
    %250 = vector.broadcast %249 : vector<1x8x16xf32> to vector<4x8x16xf32>
    %251 = arith.mulf %250, %181 : vector<4x8x16xf32>
    %cst_51 = arith.constant dense<0xFF800000> : vector<8x16xf32>
    %252 = vector.multi_reduction <maximumf>, %251, %cst_51 [0] : vector<4x8x16xf32> to vector<8x16xf32>
    %253 = vector.shape_cast %252 : vector<8x16xf32> to vector<1x8x16xf32>
    %254 = vector.broadcast %253 : vector<1x8x16xf32> to vector<4x8x16xf32>
    %255 = arith.subf %251, %254 : vector<4x8x16xf32>
    %256 = math.exp %255 : vector<4x8x16xf32>
    %cst_52 = arith.constant dense<0.000000e+00> : vector<8x16xf32>
    %257 = vector.multi_reduction <add>, %256, %cst_52 [0] : vector<4x8x16xf32> to vector<8x16xf32>
    %258 = vector.shape_cast %257 : vector<8x16xf32> to vector<1x8x16xf32>
    %259 = vector.shape_cast %258 : vector<1x8x16xf32> to vector<8x16xf32>
    %260 = vector.extract_strided_slice %182 {offsets = [3, 0, 0], sizes = [1, 8, 16], strides = [1, 1, 1]} : vector<4x8x16xf32> to vector<1x8x16xf32>
    %261 = vector.shape_cast %260 : vector<1x8x16xf32> to vector<8x16xf32>
    %262 = tpu.reciprocal %259 {approx = true} : vector<8x16xf32> -> vector<8x16xf32>
    %263 = arith.mulf %261, %262 : vector<8x16xf32>
    %264 = vector.shape_cast %263 : vector<8x16xf32> to vector<1x8x16xf32>
    %265 = vector.broadcast %264 : vector<1x8x16xf32> to vector<4x8x16xf32>
    %266 = arith.mulf %256, %265 : vector<4x8x16xf32>
    %267 = arith.addf %246, %266 : vector<4x8x16xf32>
    %268 = vector.shape_cast %267 : vector<4x8x16xf32> to vector<32x16xf32>
    %c224 = arith.constant 224 : index
    %c0_53 = arith.constant 0 : index
    %269 = vector.load %arg3[%c224, %c0_53] : memref<320x32xbf16, #tpu.memory_space<vmem>>, vector<32x32xbf16>
    %270 = arith.truncf %268 : vector<32x16xf32> to vector<32x16xbf16>
    %cst_54 = arith.constant dense<0.000000e+00> : vector<32x16xf32>
    %271 = tpu.matmul %269, %270, %cst_54 {dimension_numbers = #tpu.dot_dimension_numbers<[1], [0], [0], [1], [0, 0, 1, 1], [], []>} : vector<32x32xbf16>, vector<32x16xbf16>, vector<32x16xf32> -> vector<32x16xf32>
    %c0_55 = arith.constant 0 : index
    %c13 = arith.constant 13 : index
    %272 = vector.load %arg5[%c0_55, %c13] : memref<64x16xf32, #tpu.memory_space<vmem>>, vector<32x1xf32>
    %273 = vector.broadcast %272 : vector<32x1xf32> to vector<32x16xf32>
    %274 = arith.addf %271, %273 : vector<32x16xf32>
    %cst_56 = arith.constant dense<0.000000e+00> : vector<16xf32>
    %275 = vector.multi_reduction <add>, %274, %cst_56 [0] : vector<32x16xf32> to vector<16xf32>
    %276 = vector.shape_cast %275 : vector<16xf32> to vector<1x16xf32>
    %cst_57 = arith.constant 3.200000e+01 : f32
    %277 = vector.broadcast %cst_57 : f32 to vector<1x16xf32>
    %278 = arith.divf %276, %277 : vector<1x16xf32>
    %279 = vector.broadcast %278 : vector<1x16xf32> to vector<32x16xf32>
    %280 = arith.subf %274, %279 : vector<32x16xf32>
    %281 = arith.mulf %280, %280 : vector<32x16xf32>
    %cst_58 = arith.constant dense<0.000000e+00> : vector<16xf32>
    %282 = vector.multi_reduction <add>, %281, %cst_58 [0] : vector<32x16xf32> to vector<16xf32>
    %283 = vector.shape_cast %282 : vector<16xf32> to vector<1x16xf32>
    %cst_59 = arith.constant 3.200000e+01 : f32
    %284 = vector.broadcast %cst_59 : f32 to vector<1x16xf32>
    %285 = arith.divf %283, %284 : vector<1x16xf32>
    %cst_60 = arith.constant 9.99999997E-7 : f32
    %286 = vector.broadcast %cst_60 : f32 to vector<1x16xf32>
    %287 = arith.addf %285, %286 : vector<1x16xf32>
    %288 = math.rsqrt %287 : vector<1x16xf32>
    %289 = vector.broadcast %288 : vector<1x16xf32> to vector<32x16xf32>
    %290 = arith.mulf %280, %289 : vector<32x16xf32>
    %c0_61 = arith.constant 0 : index
    %c4 = arith.constant 4 : index
    %291 = vector.load %arg5[%c0_61, %c4] : memref<64x16xf32, #tpu.memory_space<vmem>>, vector<32x1xf32>
    %292 = vector.broadcast %291 : vector<32x1xf32> to vector<32x16xf32>
    %293 = arith.mulf %290, %292 : vector<32x16xf32>
    %c0_62 = arith.constant 0 : index
    %c5 = arith.constant 5 : index
    %294 = vector.load %arg5[%c0_62, %c5] : memref<64x16xf32, #tpu.memory_space<vmem>>, vector<32x1xf32>
    %295 = vector.broadcast %294 : vector<32x1xf32> to vector<32x16xf32>
    %296 = arith.addf %293, %295 : vector<32x16xf32>
    %c256 = arith.constant 256 : index
    %c0_63 = arith.constant 0 : index
    %297 = vector.load %arg3[%c256, %c0_63] : memref<320x32xbf16, #tpu.memory_space<vmem>>, vector<64x32xbf16>
    %298 = arith.truncf %296 : vector<32x16xf32> to vector<32x16xbf16>
    %cst_64 = arith.constant dense<0.000000e+00> : vector<64x16xf32>
    %299 = tpu.matmul %297, %298, %cst_64 {dimension_numbers = #tpu.dot_dimension_numbers<[1], [0], [0], [1], [0, 0, 1, 1], [], []>} : vector<64x32xbf16>, vector<32x16xbf16>, vector<64x16xf32> -> vector<64x16xf32>
    %c0_65 = arith.constant 0 : index
    %c15 = arith.constant 15 : index
    %300 = vector.load %arg5[%c0_65, %c15] : memref<64x16xf32, #tpu.memory_space<vmem>>, vector<64x1xf32>
    %301 = vector.broadcast %300 : vector<64x1xf32> to vector<64x16xf32>
    %302 = arith.addf %299, %301 : vector<64x16xf32>
    %cst_66 = arith.constant 5.000000e-01 : f32
    %303 = vector.broadcast %cst_66 : f32 to vector<64x16xf32>
    %304 = arith.mulf %303, %302 : vector<64x16xf32>
    %cst_67 = arith.constant 4.471500e-02 : f32
    %305 = vector.broadcast %cst_67 : f32 to vector<64x16xf32>
    %306 = arith.mulf %305, %302 : vector<64x16xf32>
    %307 = arith.mulf %306, %302 : vector<64x16xf32>
    %308 = arith.mulf %307, %302 : vector<64x16xf32>
    %309 = arith.addf %302, %308 : vector<64x16xf32>
    %cst_68 = arith.constant 0.797884583 : f32
    %310 = vector.broadcast %cst_68 : f32 to vector<64x16xf32>
    %311 = arith.mulf %310, %309 : vector<64x16xf32>
    %312 = math.tanh %311 : vector<64x16xf32>
    %cst_69 = arith.constant 1.000000e+00 : f32
    %313 = vector.broadcast %cst_69 : f32 to vector<64x16xf32>
    %314 = arith.addf %313, %312 : vector<64x16xf32>
    %315 = arith.mulf %304, %314 : vector<64x16xf32>
    %c0_70 = arith.constant 0 : index
    %c0_71 = arith.constant 0 : index
    %316 = vector.load %arg4[%c0_70, %c0_71] : memref<32x64xbf16, #tpu.memory_space<vmem>>, vector<32x64xbf16>
    %317 = arith.truncf %315 : vector<64x16xf32> to vector<64x16xbf16>
    %cst_72 = arith.constant dense<0.000000e+00> : vector<32x16xf32>
    %318 = tpu.matmul %316, %317, %cst_72 {dimension_numbers = #tpu.dot_dimension_numbers<[1], [0], [0], [1], [0, 0, 1, 1], [], []>} : vector<32x64xbf16>, vector<64x16xbf16>, vector<32x16xf32> -> vector<32x16xf32>
    %c0_73 = arith.constant 0 : index
    %c14 = arith.constant 14 : index
    %319 = vector.load %arg5[%c0_73, %c14] : memref<64x16xf32, #tpu.memory_space<vmem>>, vector<32x1xf32>
    %320 = vector.broadcast %319 : vector<32x1xf32> to vector<32x16xf32>
    %321 = arith.addf %318, %320 : vector<32x16xf32>
    %322 = arith.addf %274, %321 : vector<32x16xf32>
    %323 = tpu.transpose %322, [1, 0] : vector<32x16xf32> -> vector<16x32xf32>
    %c0_74 = arith.constant 0 : index
    %c0_75 = arith.constant 0 : index
    %324 = vector.load %arg6[%c0_74, %c0_75] : memref<16x32xf32, #tpu.memory_space<vmem>>, vector<16x32xf32>
    tpu.vector_store %arg6[%c0_74, %c0_75], %323 {strides = array<i32>} : memref<16x32xf32, #tpu.memory_space<vmem>>, vector<16x32xf32>,
    return
  }
  func.func @transform_0(%arg0: i32) -> (i32, i32) {
    %c0_i32 = arith.constant 0 : i32
    %c0_i32_0 = arith.constant 0 : i32
    return %arg0, %c0_i32 : i32, i32
  }
  func.func @transform_1(%arg0: i32) -> (i32, i32) {
    %c0_i32 = arith.constant 0 : i32
    %c0_i32_0 = arith.constant 0 : i32
    return %arg0, %c0_i32 : i32, i32
  }
  func.func @transform_2(%arg0: i32) -> (i32, i32) {
    %c0_i32 = arith.constant 0 : i32
    %c0_i32_0 = arith.constant 0 : i32
    %c0_i32_1 = arith.constant 0 : i32
    return %c0_i32, %c0_i32_0 : i32, i32
  }
  func.func @transform_3(%arg0: i32) -> (i32, i32) {
    %c0_i32 = arith.constant 0 : i32
    %c0_i32_0 = arith.constant 0 : i32
    %c0_i32_1 = arith.constant 0 : i32
    return %c0_i32, %c0_i32_0 : i32, i32
  }
  func.func @transform_4(%arg0: i32) -> (i32, i32) {
    %c0_i32 = arith.constant 0 : i32
    %c0_i32_0 = arith.constant 0 : i32
    %c0_i32_1 = arith.constant 0 : i32
    return %c0_i32, %c0_i32_0 : i32, i32
  }
  func.func @transform_5(%arg0: i32) -> (i32, i32) {
    %c0_i32 = arith.constant 0 : i32
    %c0_i32_0 = arith.constant 0 : i32
    return %arg0, %c0_i32 : i32, i32
  }
}

</mosaic_0001>

<bundles_post_ra>
// kernel: tpu_custom_call.1
= control target key start
LH: loop header
LB: loop body
LE: loop exit
PB: predicated region body
PF: predicated region fallthrough
CT: control target
= control target key end

     0   :  { %v2024_v3 = vmov 0   ;;  %v2025_v5 = vmov 1   ;;  %s2593_s0 = inlined_call_operand.vmem [shape: f32[16,32], index: 0, kind: input, shape index: {}]   ;;  %s2594_s1 = inlined_call_operand.vmem [shape: f32[16,32], index: 1, kind: input, shape index: {}]   ;;  %s2595_s2 = inlined_call_operand.vmem [shape: bf16[320,32], index: 2, kind: input, shape index: {}]   ;;  %s2596_s3 = inlined_call_operand.vmem [shape: bf16[32,64], index: 3, kind: input, shape index: {}]   ;;  %s2597_s4 = inlined_call_operand.vmem [shape: f32[64,16], index: 4, kind: input, shape index: {}]   ;;  %s2598_s5 = inlined_call_operand.hbm [shape: f32[16,32], index: 5, kind: output, shape index: {}]  }
   0x1   :  { %v22_v0 = vld [vmem:[%s2593_s0] sm:$0xff]  ;;  %v23_v2 = vld [vmem:[%s2593_s0 + $0x8] sm:$0xff]  ;;  %1839 = vset.pattern.permute.xlu1 %v2024_v3  ;;  %v2095_v6 = vld [vmem:[%s2597_s4 + $0x10] sm:$0xff] }
   0x2   :  { %v2079_v1 = vld [vmem:[%s2597_s4] sm:$0xff]  ;;  %24 = vxpose.xlu0.b32.start [1/2] (short) (narrow) %v22_v0, 32  ;;  %v2087_v4 = vld [vmem:[%s2597_s4 + $0x8] sm:$0xff]  ;;  %v2101_v7 = vld [vmem:[%s2597_s4 + $0x18] sm:$0xff] }
   0x3   :  { %140 = vperm.xlu1 %1839, %v2079_v1  }
   0x6   :  { %25 = vxpose.xlu0.b32.end [2/2] (short) (narrow) %v23_v2, 32 }
   0x7   :  { %145 = vperm.xlu1 %1839, %v2087_v4  }
   0xb   :  { %1841 = vset.pattern.permute.xlu1 %v2025_v5 }
   0xc   :  { %167 = vperm.xlu1 %1841, %v2087_v4  }
  0x10   :  { %1842 = vset.pattern.permute.xlu1 %v2024_v3 }
  0x11   :  { %150 = vperm.xlu1 %1842, %v2095_v6  }
  0x12   :  { %10 = vsyncpa [#allocation3], 0  ;;  %v1872_v8 = vld [vmem:[%s2595_s2] sm:$0xff]   ;;  %vm226_vm0 = vcmask 261120   ;;  %v2026_v9 = vmov 6   ;;  %v2027_v10 = vmov 8  }
  0x13   :  { %1747 = vmatprep.mubr.msk.bf16.mxu0 %vm226_vm0, %v1872_v8  ;;  %v2028_v11 = vmov 7   ;;  %vm90_vm1 = vcmask 130048   ;;  %vm1551_vm2 = vcmask 523264  }
  0x15   :  { %155 = vperm.xlu1 %1842, %v2101_v7  }
  0x19   :  { %1843 = vset.pattern.permute.xlu1 %v2025_v5 }
  0x1a   :  { %171 = vperm.xlu1 %1843, %v2095_v6  }
  0x1e   :  { %175 = vperm.xlu1 %1843, %v2101_v7  }
  0x22   :  { %1844 = vset.pattern.permute.xlu1 %v2026_v9 }
  0x23   :  { %327 = vperm.xlu1 %1844, %v2079_v1  }
  0x27   :  { %331 = vperm.xlu1 %1844, %v2087_v4  }
  0x2b   :  { %335 = vperm.xlu1 %1844, %v2095_v6  }
  0x2f   :  { %1840 = vset.pattern.permute.xlu0 %v2025_v5  ;;  %1845 = vset.pattern.permute.xlu1 %v2028_v11 }
  0x30   :  { %351 = vperm.xlu1 %1845, %v2079_v1  }
  0x34   :  { %355 = vperm.xlu1 %1845, %v2087_v4  }
  0x37   :  { %163 = vperm.xlu0 %1840, %v2079_v1  }
  0x38   :  { %359 = vperm.xlu1 %1845, %v2095_v6  }
  0x3b   :  { %1847 = vset.pattern.permute.xlu0 %v2027_v10 }
  0x3c   :  { %371 = vperm.xlu0 %1847, %v2079_v1   ;;  %363 = vperm.xlu1 %1845, %v2101_v7  }
  0x40   :  { %383 = vperm.xlu0 %1847, %v2101_v7   ;;  %1846 = vset.pattern.permute.xlu1 %v2026_v9 }
  0x41   :  { %339 = vperm.xlu1 %1846, %v2101_v7  }
  0x45   :  { %1848 = vset.pattern.permute.xlu1 %v2027_v10 }
  0x46   :  { %375 = vperm.xlu1 %1848, %v2087_v4  }
  0x4a   :  { %379 = vperm.xlu1 %1848, %v2095_v6  }
  0x82   :  { %v40_v12 = vpop.trf.xlu0  ;;  %v141_v40 = vpop.permute.xlu1 %140 }
  0x83   :  { %v91_v16 = vsel %vm90_vm1, %v40_v12, 0.0 }
  0x86   :  { %v41_v13 = vpop.trf.xlu0  ;;  %v146_v47 = vpop.permute.xlu1 %145 }
  0x87   :  { %v92_v14 = vsel %vm90_vm1, %v41_v13, 0.0 }
  0x88   :  { %v93_v18 = vadd.f32 %v92_v14, %v91_v16  ;;  %v1873_v16 = vld [vmem:[%s2595_s2 + $0x8] sm:$0xff]  }
  0x8a   :  { %v42_v15 = vpop.trf.xlu0 }
  0x8b   :  { %v94_v17 = vsel %vm90_vm1, %v42_v15, 0.0  ;;  %v168_v50 = vpop.permute.xlu1 %167 }
  0x8c   :  { %v95_v19 = vadd.f32 %v94_v17, %v93_v18  ;;  %v1874_v17 = vld [vmem:[%s2595_s2 + $0x10] sm:$0xff]   ;;  %v1875_v18 = vld [vmem:[%s2595_s2 + $0x18] sm:$0xff]  }
  0x8e   :  { %v43_v20 = vpop.trf.xlu0 }
  0x8f   :  { %v96_v21 = vsel %vm90_vm1, %v43_v20, 0.0 }
  0x90   :  { %v97_v22 = vadd.f32 %v96_v21, %v95_v19  ;;  %v151_v54 = vpop.permute.xlu1 %150  ;;  %v1876_v19 = vld [vmem:[%s2595_s2 + $0x20] sm:$0xff]   ;;  %v1878_v21 = vld [vmem:[%s2595_s2 + $0x30] sm:$0xff]  }
  0x91   :  { %1763 = vmatprep.mubr.msk.bf16.mxu1 %vm226_vm0, %v1878_v21 }
  0x92   :  { %v98_v23 = vrot.slane %v97_v22, 4 }
  0x94   :  { %v99_v24 = vadd.f32 %v98_v23, %v97_v22  ;;  %v156_v57 = vpop.permute.xlu1 %155  ;;  %v2029_v23 = vmov 9  }
  0x95   :  { %1849 = vset.pattern.permute.xlu1 %v2029_v23  ;;  %1850 = vset.pattern.permute.xlu0 %v2029_v23 }
  0x96   :  { %v100_v25 = vrot.slane %v99_v24, 2  ;;  %557 = vperm.xlu1 %1849, %v2079_v1   ;;  %561 = vperm.xlu0 %1850, %v2087_v4  }
  0x98   :  { %v101_v26 = vadd.f32 %v100_v25, %v99_v24  ;;  %v2030_v25 = vmov 2  }
  0x99   :  { %v172_v58 = vpop.permute.xlu1 %171 }
  0x9a   :  { %v102_v27 = vrot.slane %v101_v26, 1  ;;  %565 = vperm.xlu1 %1849, %v2095_v6   ;;  %1851 = vset.pattern.permute.xlu0 %v2030_v25 }
  0x9b   :  { %684 = vperm.xlu0 %1851, %v2079_v1  }
  0x9c   :  { %v103_v28 = vadd.f32 %v102_v27, %v101_v26  ;;  %v2031_v27 = vmov 3  }
  0x9d   :  { %v176_v0 = vpop.permute.xlu1 %175 }
  0x9e   :  { %v105_v29 = vmul.f32 0.03125, %v103_v28  ;;  %569 = vperm.xlu1 %1849, %v2101_v7  }
  0x9f   :  { %1854 = vset.pattern.permute.xlu0 %v2031_v27 }
  0xa0   :  { %v107_v30 = vsub.f32 %v41_v13, %v105_v29  ;;  %v108_v31 = vsub.f32 %v42_v15, %v105_v29  ;;  %v109_v32 = vsub.f32 %v43_v20, %v105_v29  ;;  %v106_v33 = vsub.f32 %v40_v12, %v105_v29  ;;  %v1877_v20 = vld [vmem:[%s2595_s2 + $0x28] sm:$0xff]   ;;  %708 = vperm.xlu0 %1854, %v2087_v4  }
  0xa2   :  { %v110_v34 = vmul.f32 %v106_v33, %v106_v33  ;;  %v111_v35 = vmul.f32 %v107_v30, %v107_v30  ;;  %v112_v36 = vmul.f32 %v108_v31, %v108_v31  ;;  %v113_v37 = vmul.f32 %v109_v32, %v109_v32  ;;  %v328_v22 = vpop.permute.xlu1 %327  ;;  %1852 = vset.pattern.permute.xlu1 %v2030_v25 }
  0xa3   :  { %688 = vperm.xlu1 %1852, %v2087_v4  }
  0xa4   :  { %v114_v38 = vsel %vm90_vm1, %v110_v34, 0.0  ;;  %v115_v39 = vsel %vm90_vm1, %v111_v35, 0.0  ;;  %v117_v42 = vsel %vm90_vm1, %v112_v36, 0.0  ;;  %v119_v44 = vsel %vm90_vm1, %v113_v37, 0.0  ;;  %712 = vperm.xlu0 %1854, %v2095_v6  }
  0xa5   :  { %v116_v41 = vadd.f32 %v115_v39, %v114_v38 }
  0xa6   :  { %v332_v24 = vpop.permute.xlu1 %331 }
  0xa7   :  { %v118_v43 = vadd.f32 %v117_v42, %v116_v41  ;;  %1853 = vset.pattern.permute.xlu1 %v2031_v27  ;;  %v56_v41 = vld [vmem:[%s2594_s1] sm:$0xff] }
  0xa8   :  { %704 = vperm.xlu1 %1853, %v2079_v1  }
  0xa9   :  { %v120_v45 = vadd.f32 %v119_v44, %v118_v43 }
  0xaa   :  { %v336_v26 = vpop.permute.xlu1 %335 }
  0xab   :  { %v121_v46 = vrot.slane %v120_v45, 4 }
  0xac   :  { %1855 = vset.pattern.permute.xlu1 %v2030_v25 }
  0xad   :  { %v122_v48 = vadd.f32 %v121_v46, %v120_v45  ;;  %692 = vperm.xlu1 %1855, %v2095_v6  }
  0xaf   :  { %v123_v49 = vrot.slane %v122_v48, 2  ;;  %v352_v28 = vpop.permute.xlu1 %351 }
  0xb1   :  { %v124_v51 = vadd.f32 %v123_v49, %v122_v48  ;;  %696 = vperm.xlu1 %1855, %v2101_v7  }
  0xb3   :  { %v125_v52 = vrot.slane %v124_v51, 1  ;;  %v356_v29 = vpop.permute.xlu1 %355 }
  0xb5   :  { %v126_v53 = vadd.f32 %v125_v52, %v124_v51  ;;  %1856 = vset.pattern.permute.xlu1 %v2031_v27  ;;  %v57_v51 = vld [vmem:[%s2594_s1 + $0x8] sm:$0xff] }
  0xb6   :  { %v164_v2 = vpop.permute.xlu0 %163  ;;  %716 = vperm.xlu1 %1856, %v2101_v7  }
  0xb7   :  { %v127_v55 = vmul.f32 0.03125, %v126_v53 }
  0xb9   :  { %v128_v56 = vadd.f32 1e-06, %v127_v55 }
  0xbb   :  { %1894 = vrsqrt.f32 %v128_v56 }
  0xc2   :  { %58 = vxpose.xlu0.b32.start [1/2] (short) (narrow) %v56_v41, 32 }
  0xc5   :  { %v1895_v59 = vpop.eup %1894 }
  0xc6   :  { %v130_v60 = vmul.f32 %v1895_v59, %v106_v33  ;;  %v131_v61 = vmul.f32 %v1895_v59, %v107_v30  ;;  %v132_v62 = vmul.f32 %v1895_v59, %v108_v31  ;;  %v133_v63 = vmul.f32 %v1895_v59, %v109_v32  ;;  %v360_v30 = vpop.permute.xlu1 %359  ;;  %59 = vxpose.xlu0.b32.end [2/2] (short) (narrow) %v57_v51, 32 }
  0xc8   :  { %v158_v3 = vmul.f32 %v141_v40, %v130_v60  ;;  %v159_v5 = vmul.f32 %v146_v47, %v131_v61  ;;  %v160_v8 = vmul.f32 %v151_v54, %v132_v62  ;;  %v161_v9 = vmul.f32 %v156_v57, %v133_v63 }
  0xca   :  { %v2131_v10 = vadd.f32 %v168_v50, %v159_v5  ;;  %v2133_v11 = vadd.f32 %v172_v58, %v160_v8  ;;  %v2135_v12 = vadd.f32 %v176_v0, %v161_v9  ;;  %v2137_v13 = vadd.f32 %v164_v2, %v158_v3  ;;  %v364_v31 = vpop.permute.xlu1 %363 }
  0xcc   :  { %v194_v14 = vpack.c.bf16 %v2131_v10, %v2137_v13  ;;  %v195_v15 = vpack.c.bf16 %v2135_v12, %v2133_v11 }
  0xce   :  { %1743 = vmatprep.subr.bf16.mxu0 %v194_v14  ;;  %v340_v34 = vpop.permute.xlu1 %339 }
  0xcf   :  { %1744 = vmatpush3.bf16.msra.mxu0 %v194_v14 }
  0xd0   :  { %1745 = vmatprep.subr.bf16.mxu0 %v195_v15 }
  0xd3   :  { %1746 = vmatpush3.bf16.msra.mxu0 %v195_v15 }
  0xd6   :  { %1748 = vmatmul.mubr.msk.bf16.vlgmr.msra.gmra.mrb[0].mxu0 %vm226_vm0, %v1873_v16 }
  0xd7   :  { %1751 = vmatprep.mubr.msk.bf16.mxu0 %vm226_vm0, %v1874_v17 }
  0xde   :  { %1752 = vmatmul.mubr.msk.bf16.gmra.mrb[4].mxu0 %vm226_vm0, %v1875_v18 }
  0xdf   :  { %1755 = vmatprep.mubr.msk.bf16.mxu0 %vm226_vm0, %v1876_v19 }
  0xe6   :  { %1756 = vmatmul.mubr.msk.bf16.gmra.mrb[8].mxu0 %vm226_vm0, %v1877_v20 }
 0x1a9   :  { %v1749_v32 = vpop.f32.mrb[0].mxu0 }
 0x1aa   :  { %v279_v33 = vpop.f32.mrb[1].mxu0  ;;  %v344_v37 = vadd.f32 %v1749_v32, %v336_v26 }
 0x1ab   :  { %v1750_v35 = vpop.f32.mrb[2].mxu0  ;;  %v342_v38 = vadd.f32 %v328_v22, %v279_v33 }
 0x1ac   :  { %v282_v36 = vpop.f32.mrb[3].mxu0  ;;  %v345_v39 = vadd.f32 %v1750_v35, %v340_v34  ;;  %v348_v42 = vmul.f32 0.35355338, %v344_v37 }
 0x1ad   :  { %v343_v40 = vadd.f32 %v332_v24, %v282_v36  ;;  %v346_v43 = vmul.f32 0.35355338, %v342_v38 }
 0x1ae   :  { %v349_v45 = vmul.f32 0.35355338, %v345_v39 }
 0x1af   :  { %v347_v46 = vmul.f32 0.35355338, %v343_v40 }
 0x1b1   :  { %v1753_v44 = vpop.f32.mrb[4].mxu0 }
 0x1b2   :  { %v368_v47 = vadd.f32 %v1753_v44, %v360_v30  ;;  %v295_v48 = vpop.f32.mrb[5].mxu0 }
 0x1b3   :  { %v366_v49 = vadd.f32 %v352_v28, %v295_v48  ;;  %v1754_v50 = vpop.f32.mrb[6].mxu0 }
 0x1b4   :  { %v2185_v52 = vmul.f32 %v368_v47, %v346_v43  ;;  %v2187_v53 = vmul.f32 %v368_v47, %v347_v46  ;;  %v2189_v54 = vmul.f32 %v368_v47, %v348_v42  ;;  %v2191_v55 = vmul.f32 %v368_v47, %v349_v45  ;;  %v298_v56 = vpop.f32.mrb[7].mxu0 }
 0x1b5   :  { %v390_v57 = vmul.f32 %v366_v49, %v346_v43  ;;  %v430_v58 = vmul.f32 %v366_v49, %v347_v46  ;;  %v470_v59 = vmul.f32 %v366_v49, %v348_v42  ;;  %v2193_v60 = vmul.f32 %v366_v49, %v349_v45 }
 0x1b6   :  { %v396_v61 = vsel %vm90_vm1, %v2185_v52, -inf  ;;  %v436_v62 = vsel %vm90_vm1, %v2187_v53, -inf  ;;  %v476_v63 = vsel %vm90_vm1, %v2189_v54, -inf  ;;  %v516_v0 = vsel %vm90_vm1, %v2191_v55, -inf }
 0x1b7   :  { %v369_v2 = vadd.f32 %v1754_v50, %v364_v31  ;;  %v367_v3 = vadd.f32 %v356_v29, %v298_v56  ;;  %v394_v5 = vsel %vm90_vm1, %v390_v57, -inf  ;;  %v434_v8 = vsel %vm90_vm1, %v430_v58, -inf }
 0x1b8   :  { %v474_v9 = vsel %vm90_vm1, %v470_v59, -inf  ;;  %v514_v14 = vsel %vm90_vm1, %v2193_v60, -inf }
 0x1b9   :  { %v2208_v15 = vpop.f32.mrb[8].mxu0  ;;  %v2210_v16 = vmul.f32 %v369_v2, %v346_v43  ;;  %v2212_v17 = vmul.f32 %v369_v2, %v347_v46  ;;  %v473_v18 = vmul.f32 %v369_v2, %v348_v42  ;;  %v2214_v19 = vmul.f32 %v369_v2, %v349_v45 }
 0x1ba   :  { %v2216_v20 = vpop.f32.mrb[9].mxu0  ;;  %v391_v21 = vmul.f32 %v367_v3, %v346_v43  ;;  %v431_v22 = vmul.f32 %v367_v3, %v347_v46  ;;  %v471_v23 = vmul.f32 %v367_v3, %v348_v42  ;;  %v511_v24 = vmul.f32 %v367_v3, %v349_v45 }
 0x1bb   :  { %v2218_v25 = vpop.f32.mrb[10].mxu0  ;;  %v397_v26 = vsel %vm90_vm1, %v2210_v16, -inf  ;;  %v437_v27 = vsel %vm90_vm1, %v2212_v17, -inf  ;;  %v477_v28 = vsel %vm90_vm1, %v473_v18, -inf  ;;  %v517_v29 = vsel %vm90_vm1, %v2214_v19, -inf }
 0x1bc   :  { %v2227_v30 = vpop.f32.mrb[11].mxu0  ;;  %v399_v31 = vmax.f32 %v396_v61, %v397_v26  ;;  %v439_v32 = vmax.f32 %v436_v62, %v437_v27  ;;  %v479_v33 = vmax.f32 %v476_v63, %v477_v28  ;;  %v519_v34 = vmax.f32 %v516_v0, %v517_v29 }
 0x1bd   :  { %v395_v35 = vsel %vm90_vm1, %v391_v21, -inf  ;;  %v435_v36 = vsel %vm90_vm1, %v431_v22, -inf  ;;  %v475_v37 = vsel %vm90_vm1, %v471_v23, -inf  ;;  %v515_v38 = vsel %vm90_vm1, %v511_v24, -inf }
 0x1be   :  { %v398_v39 = vmax.f32 %v394_v5, %v395_v35  ;;  %v438_v40 = vmax.f32 %v434_v8, %v435_v36  ;;  %v478_v41 = vmax.f32 %v474_v9, %v475_v37  ;;  %v518_v42 = vmax.f32 %v514_v14, %v515_v38 }
 0x1c0   :  { %v400_v43 = vmax.f32 %v398_v39, %v399_v31  ;;  %v440_v44 = vmax.f32 %v438_v40, %v439_v32  ;;  %v480_v45 = vmax.f32 %v478_v41, %v479_v33  ;;  %v520_v46 = vmax.f32 %v518_v42, %v519_v34 }
 0x1c2   :  { %v401_v47 = vsub.f32 %v390_v57, %v400_v43  ;;  %v402_v48 = vsub.f32 %v391_v21, %v400_v43  ;;  %v403_v49 = vsub.f32 %v2185_v52, %v400_v43  ;;  %v404_v50 = vsub.f32 %v2210_v16, %v400_v43 }
 0x1c3   :  { %v441_v51 = vsub.f32 %v430_v58, %v440_v44  ;;  %v442_v56 = vsub.f32 %v431_v22, %v440_v44  ;;  %v443_v61 = vsub.f32 %v2187_v53, %v440_v44  ;;  %v444_v62 = vsub.f32 %v2212_v17, %v440_v44 }
 0x1c4   :  { %v405_v63 = vmul.f32 1.442695, %v401_v47  ;;  %v407_v0 = vmul.f32 1.442695, %v402_v48  ;;  %v481_v2 = vsub.f32 %v470_v59, %v480_v45  ;;  %v482_v3 = vsub.f32 %v471_v23, %v480_v45 }
 0x1c5   :  { %v445_v5 = vmul.f32 1.442695, %v441_v51  ;;  %v447_v8 = vmul.f32 1.442695, %v442_v56  ;;  %v483_v9 = vsub.f32 %v2189_v54, %v480_v45  ;;  %v484_v57 = vsub.f32 %v473_v18, %v480_v45 }
 0x1c6   :  { %1896 = vpow2.f32 %v405_v63  ;;  %v485_v14 = vmul.f32 1.442695, %v481_v2  ;;  %v521_v52 = vsub.f32 %v2193_v60, %v520_v46  ;;  %v487_v58 = vmul.f32 1.442695, %v482_v3  ;;  %v376_v3 = vpop.permute.xlu1 %375 }
 0x1c7   :  { %1898 = vpow2.f32 %v407_v0  ;;  %v522_v16 = vsub.f32 %v511_v24, %v520_v46  ;;  %v489_v53 = vmul.f32 1.442695, %v483_v9  ;;  %v523_v17 = vsub.f32 %v2191_v55, %v520_v46 }
 0x1c8   :  { %1900 = vpow2.f32 %v445_v5  ;;  %v524_v21 = vsub.f32 %v2214_v19, %v520_v46  ;;  %v491_v59 = vmul.f32 1.442695, %v484_v57  ;;  %v525_v22 = vmul.f32 1.442695, %v521_v52 }
 0x1c9   :  { %1902 = vpow2.f32 %v447_v8  ;;  %v527_v54 = vmul.f32 1.442695, %v522_v16  ;;  %v529_v18 = vmul.f32 1.442695, %v523_v17  ;;  %v409_v60 = vmul.f32 1.442695, %v403_v49  ;;  %v372_v17 = vpop.permute.xlu0 %371 }
 0x1ca   :  { %1904 = vpow2.f32 %v485_v14  ;;  %v531_v23 = vmul.f32 1.442695, %v524_v21  ;;  %v411_v24 = vmul.f32 1.442695, %v404_v50  ;;  %v449_v55 = vmul.f32 1.442695, %v443_v61 }
 0x1cb   :  { %1906 = vpow2.f32 %v487_v58  ;;  %v451_v28 = vmul.f32 1.442695, %v444_v62 }
 0x1cc   :  { %1908 = vpow2.f32 %v489_v53 }
 0x1cd   :  { %1910 = vpow2.f32 %v491_v59 }
 0x1ce   :  { %1912 = vpow2.f32 %v525_v22 }
 0x1cf   :  { %1914 = vpow2.f32 %v527_v54 }
 0x1d0   :  { %v2241_v26 = vpop.eup %1896  ;;  %1916 = vpow2.f32 %v529_v18  ;;  %v380_v18 = vpop.permute.xlu1 %379 }
 0x1d1   :  { %v2243_v27 = vpop.eup %1898  ;;  %1918 = vpow2.f32 %v531_v23  ;;  %v413_v19 = vsel %vm90_vm1, %v2241_v26, 0.0  ;;  %v388_v23 = vadd.f32 %v2208_v15, %v380_v18 }
 0x1d2   :  { %v2247_v29 = vpop.eup %1900  ;;  %1920 = vpow2.f32 %v409_v60  ;;  %v414_v31 = vsel %vm90_vm1, %v2243_v27, 0.0  ;;  %v384_v60 = vpop.permute.xlu0 %383 }
 0x1d3   :  { %v2251_v32 = vpop.eup %1902  ;;  %1922 = vpow2.f32 %v411_v24  ;;  %v415_v33 = vadd.f32 %v414_v31, %v413_v19  ;;  %v453_v34 = vsel %vm90_vm1, %v2247_v29, 0.0  ;;  %v389_v19 = vadd.f32 %v2218_v25, %v384_v60 }
 0x1d4   :  { %v1905_v35 = vpop.eup %1904  ;;  %1924 = vpow2.f32 %v449_v55  ;;  %v454_v36 = vsel %vm90_vm1, %v2251_v32, 0.0 }
 0x1d5   :  { %v1907_v37 = vpop.eup %1906  ;;  %v493_v38 = vsel %vm90_vm1, %v1905_v35, 0.0  ;;  %1926 = vpow2.f32 %v451_v28  ;;  %v455_v39 = vadd.f32 %v454_v36, %v453_v34 }
 0x1d6   :  { %v1909_v40 = vpop.eup %1908  ;;  %v494_v41 = vsel %vm90_vm1, %v1907_v37, 0.0 }
 0x1d7   :  { %v1911_v42 = vpop.eup %1910  ;;  %v495_v43 = vadd.f32 %v494_v41, %v493_v38  ;;  %v496_v45 = vsel %vm90_vm1, %v1909_v40, 0.0  ;;  %v386_v38 = vadd.f32 %v372_v17, %v2216_v20 }
 0x1d8   :  { %v1913_v44 = vpop.eup %1912  ;;  %v498_v50 = vsel %vm90_vm1, %v1911_v42, 0.0 }
 0x1d9   :  { %v1915_v46 = vpop.eup %1914  ;;  %v497_v47 = vadd.f32 %v496_v45, %v495_v43  ;;  %v533_v48 = vsel %vm90_vm1, %v1913_v44, 0.0  ;;  %v387_v45 = vadd.f32 %v376_v3, %v2227_v30 }
 0x1da   :  { %v1917_v49 = vpop.eup %1916  ;;  %v534_v51 = vsel %vm90_vm1, %v1915_v46, 0.0 }
 0x1db   :  { %v1919_v56 = vpop.eup %1918  ;;  %v499_v61 = vadd.f32 %v498_v50, %v497_v47  ;;  %v535_v62 = vadd.f32 %v534_v51, %v533_v48  ;;  %v536_v0 = vsel %vm90_vm1, %v1917_v49, 0.0 }
 0x1dc   :  { %v1921_v63 = vpop.eup %1920  ;;  %v538_v14 = vsel %vm90_vm1, %v1919_v56, 0.0 }
 0x1dd   :  { %v1923_v2 = vpop.eup %1922  ;;  %v416_v5 = vsel %vm90_vm1, %v1921_v63, 0.0  ;;  %1928 = vrcp.f32 %v499_v61  ;;  %v537_v8 = vadd.f32 %v536_v0, %v535_v62 }
 0x1de   :  { %v1925_v9 = vpop.eup %1924  ;;  %v417_v57 = vadd.f32 %v416_v5, %v415_v33  ;;  %v418_v58 = vsel %vm90_vm1, %v1923_v2, 0.0 }
 0x1df   :  { %v1927_v52 = vpop.eup %1926  ;;  %v456_v16 = vsel %vm90_vm1, %v1925_v9, 0.0  ;;  %v539_v53 = vadd.f32 %v538_v14, %v537_v8 }
 0x1e0   :  { %v419_v21 = vadd.f32 %v418_v58, %v417_v57  ;;  %v457_v59 = vadd.f32 %v456_v16, %v455_v39  ;;  %v458_v22 = vsel %vm90_vm1, %v1927_v52, 0.0  ;;  %v2034_v58 = vmov 11   ;;  %v558_v16 = vpop.permute.xlu1 %557 }
 0x1e1   :  { %1930 = vrcp.f32 %v539_v53 }
 0x1e2   :  { %1932 = vrcp.f32 %v419_v21  ;;  %v459_v54 = vadd.f32 %v458_v22, %v457_v59  ;;  %v562_v59 = vpop.permute.xlu0 %561 }
 0x1e4   :  { %1934 = vrcp.f32 %v459_v54  ;;  %v566_v53 = vpop.permute.xlu1 %565 }
 0x1e7   :  { %v1929_v24 = vpop.eup %1928 }
 0x1e8   :  { %v501_v55 = vmul.f32 %v1929_v24, %v388_v23  ;;  %v570_v23 = vpop.permute.xlu1 %569 }
 0x1ea   :  { %v502_v28 = vmul.f32 %v1905_v35, %v501_v55  ;;  %v503_v31 = vmul.f32 %v1907_v37, %v501_v55  ;;  %v504_v33 = vmul.f32 %v1909_v40, %v501_v55  ;;  %v505_v34 = vmul.f32 %v1911_v42, %v501_v55 }
 0x1eb   :  { %v1931_v36 = vpop.eup %1930 }
 0x1ec   :  { %v1933_v39 = vpop.eup %1932  ;;  %v541_v41 = vmul.f32 %v1931_v36, %v389_v19 }
 0x1ed   :  { %v421_v43 = vmul.f32 %v1933_v39, %v386_v38 }
 0x1ee   :  { %v1935_v47 = vpop.eup %1934  ;;  %v542_v48 = vmul.f32 %v1913_v44, %v541_v41  ;;  %v543_v15 = vmul.f32 %v1915_v46, %v541_v41  ;;  %v544_v50 = vmul.f32 %v1917_v49, %v541_v41  ;;  %v545_v51 = vmul.f32 %v1919_v56, %v541_v41 }
 0x1ef   :  { %v424_v61 = vmul.f32 %v1921_v63, %v421_v43  ;;  %v425_v62 = vmul.f32 %v1923_v2, %v421_v43  ;;  %v461_v25 = vmul.f32 %v1935_v47, %v387_v45  ;;  %v422_v35 = vmul.f32 %v2241_v26, %v421_v43 }
 0x1f0   :  { %v423_v37 = vmul.f32 %v2243_v27, %v421_v43 }
 0x1f1   :  { %v464_v40 = vmul.f32 %v1925_v9, %v461_v25  ;;  %v465_v42 = vmul.f32 %v1927_v52, %v461_v25  ;;  %v462_v20 = vmul.f32 %v2247_v29, %v461_v25  ;;  %v463_v0 = vmul.f32 %v2251_v32, %v461_v25  ;;  %v1879_v29 = vld [vmem:[%s2595_s2 + $0x38] sm:$0xff]   ;;  %v1880_v32 = vld [vmem:[%s2595_s2 + $0x40] sm:$0xff]  }
 0x1f2   :  { %v2032_v9 = vmov 10   ;;  %v2033_v52 = vmov 12  }
 0x1f3   :  { %v466_v5 = vadd.f32 %v462_v20, %v422_v35  ;;  %v467_v30 = vadd.f32 %v463_v0, %v423_v37  ;;  %v468_v3 = vadd.f32 %v464_v40, %v424_v61  ;;  %v469_v44 = vadd.f32 %v465_v42, %v425_v62  ;;  %1857 = vset.pattern.permute.xlu1 %v2032_v9 }
 0x1f4   :  { %1860 = vset.pattern.permute.xlu0 %v2033_v52  ;;  %730 = vperm.xlu1 %1857, %v2079_v1  }
 0x1f5   :  { %v506_v46 = vadd.f32 %v502_v28, %v466_v5  ;;  %v507_v49 = vadd.f32 %v503_v31, %v467_v30  ;;  %v508_v56 = vadd.f32 %v504_v33, %v468_v3  ;;  %v509_v63 = vadd.f32 %v505_v34, %v469_v44  ;;  %942 = vperm.xlu0 %1860, %v2079_v1  }
 0x1f7   :  { %v546_v2 = vadd.f32 %v542_v48, %v506_v46  ;;  %v547_v8 = vadd.f32 %v543_v15, %v507_v49  ;;  %v548_v57 = vadd.f32 %v544_v50, %v508_v56  ;;  %v549_v26 = vadd.f32 %v545_v51, %v509_v63  ;;  %v689_v46 = vpop.permute.xlu1 %688  ;;  %v685_v56 = vpop.permute.xlu0 %684 }
 0x1f8   :  { %734 = vperm.xlu1 %1857, %v2087_v4  }
 0x1f9   :  { %v554_v14 = vpack.c.bf16 %v547_v8, %v546_v2  ;;  %v555_v27 = vpack.c.bf16 %v549_v26, %v548_v57 }
 0x1fb   :  { %1759 = vmatprep.subr.bf16.mxu1 %v554_v14  ;;  %v705_v8 = vpop.permute.xlu1 %704  ;;  %v709_v26 = vpop.permute.xlu0 %708 }
 0x1fc   :  { %1760 = vmatpush3.bf16.msra.mxu1 %v554_v14  ;;  %738 = vperm.xlu1 %1857, %v2095_v6  }
 0x1fd   :  { %1761 = vmatprep.subr.bf16.mxu1 %v555_v27 }
 0x200   :  { %1762 = vmatpush3.bf16.msra.mxu1 %v555_v27  ;;  %1858 = vset.pattern.permute.xlu1 %v2034_v58  ;;  %v693_v27 = vpop.permute.xlu1 %692 }
 0x201   :  { %922 = vperm.xlu1 %1858, %v2079_v1  }
 0x203   :  { %1764 = vmatmul.mubr.msk.bf16.vlgmr.msra.gmra.mrb[0].mxu1 %vm226_vm0, %v1879_v29  ;;  %v713_v29 = vpop.permute.xlu0 %712 }
 0x204   :  { %1771 = vmatprep.mubr.msk.bf16.mxu1 %vm226_vm0, %v1880_v32  ;;  %v697_v32 = vpop.permute.xlu1 %696 }
 0x205   :  { %926 = vperm.xlu1 %1858, %v2087_v4  }
 0x209   :  { %930 = vperm.xlu1 %1858, %v2095_v6  }
 0x20d   :  { %934 = vperm.xlu1 %1858, %v2101_v7  }
 0x211   :  { %1859 = vset.pattern.permute.xlu1 %v2032_v9  ;;  %v74_v9 = vpop.trf.xlu0 }
 0x212   :  { %742 = vperm.xlu1 %1859, %v2101_v7  }
 0x216   :  { %1861 = vset.pattern.permute.xlu1 %v2033_v52 }
 0x217   :  { %946 = vperm.xlu1 %1861, %v2087_v4  }
 0x21b   :  { %950 = vperm.xlu1 %1861, %v2095_v6  }
 0x21f   :  { %954 = vperm.xlu1 %1861, %v2101_v7  }
 0x2d6   :  { %v1765_v17 = vpop.f32.mrb[0].mxu1 }
 0x2d7   :  { %v622_v21 = vpop.f32.mrb[1].mxu1  ;;  %v631_v22 = vadd.f32 %v1765_v17, %v566_v53 }
 0x2d8   :  { %v623_v54 = vadd.f32 %v622_v21, %v558_v16  ;;  %v1766_v18 = vpop.f32.mrb[2].mxu1  ;;  %v717_v21 = vpop.permute.xlu1 %716 }
 0x2d9   :  { %v625_v60 = vpop.f32.mrb[3].mxu1  ;;  %v634_v24 = vadd.f32 %v1766_v18, %v570_v23  ;;  %v639_v19 = vadd.f32 %v631_v22, %v2133_v11 }
 0x2da   :  { %v637_v1 = vadd.f32 %v623_v54, %v2137_v13  ;;  %v626_v55 = vadd.f32 %v625_v60, %v562_v59  ;;  %v75_v59 = vpop.trf.xlu0 }
 0x2db   :  { %v640_v33 = vadd.f32 %v634_v24, %v2135_v12  ;;  %v644_v38 = vsel %vm90_vm1, %v639_v19, 0.0 }
 0x2dc   :  { %v638_v28 = vadd.f32 %v626_v55, %v2131_v10  ;;  %v641_v31 = vsel %vm90_vm1, %v637_v1, 0.0 }
 0x2dd   :  { %v646_v13 = vsel %vm90_vm1, %v640_v33, 0.0 }
 0x2de   :  { %v642_v34 = vsel %vm90_vm1, %v638_v28, 0.0 }
 0x2df   :  { %v643_v36 = vadd.f32 %v642_v34, %v641_v31  ;;  %v76_v31 = vpop.trf.xlu0  ;;  %v1881_v34 = vld [vmem:[%s2595_s2 + $0x48] sm:$0xff]  }
 0x2e1   :  { %v645_v39 = vadd.f32 %v644_v38, %v643_v36  ;;  %v1882_v38 = vld [vmem:[%s2595_s2 + $0x50] sm:$0xff]  }
 0x2e3   :  { %v647_v11 = vadd.f32 %v646_v13, %v645_v39  ;;  %v77_v36 = vpop.trf.xlu0  ;;  %v1883_v13 = vld [vmem:[%s2595_s2 + $0x58] sm:$0xff]  }
 0x2e4   :  { %v823_v39 = vpack.c.bf16 %v77_v36, %v76_v31 }
 0x2e5   :  { %v648_v41 = vrot.slane %v647_v11, 4 }
 0x2e7   :  { %v649_v10 = vadd.f32 %v648_v41, %v647_v11  ;;  %v1884_v11 = vld [vmem:[%s2595_s2 + $0x60] sm:$0xff]   ;;  %v1885_v41 = vld [vmem:[%s2595_s2 + $0x68] sm:$0xff]  }
 0x2e9   :  { %v650_v43 = vrot.slane %v649_v10, 2 }
 0x2eb   :  { %v651_v45 = vadd.f32 %v650_v43, %v649_v10  ;;  %v1886_v10 = vld [vmem:[%s2595_s2 + $0x70] sm:$0xff]   ;;  %v731_v43 = vpop.permute.xlu1 %730 }
 0x2ec   :  { %1791 = vmatprep.mubr.msk.bf16.mxu0 %vm226_vm0, %v1886_v10 }
 0x2ed   :  { %v652_v12 = vrot.slane %v651_v45, 1 }
 0x2ef   :  { %v653_v47 = vadd.f32 %v652_v12, %v651_v45  ;;  %v2035_v45 = vmov 13   ;;  %v2036_v12 = vmov 4  }
 0x2f0   :  { %1862 = vset.pattern.permute.xlu1 %v2035_v45  ;;  %1866 = vset.pattern.permute.xlu0 %v2036_v12 }
 0x2f1   :  { %v654_v48 = vmul.f32 0.03125, %v653_v47  ;;  %v2336_v47 = vld [vmem:[%s2597_s4] sm:$0xff]  ;;  %1263 = vperm.xlu0 %1866, %v2101_v7  }
 0x2f2   :  { %1128 = vperm.xlu1 %1862, %v2336_v47  }
 0x2f3   :  { %v656_v15 = vsub.f32 %v638_v28, %v654_v48  ;;  %v658_v4 = vsub.f32 %v640_v33, %v654_v48  ;;  %v655_v50 = vsub.f32 %v637_v1, %v654_v48  ;;  %v657_v51 = vsub.f32 %v639_v19, %v654_v48  ;;  %v735_v48 = vpop.permute.xlu1 %734 }
 0x2f4   :  { %v822_v33 = vpack.c.bf16 %v75_v59, %v74_v9 }
 0x2f5   :  { %v660_v61 = vmul.f32 %v656_v15, %v656_v15  ;;  %v659_v62 = vmul.f32 %v655_v50, %v655_v50  ;;  %v661_v25 = vmul.f32 %v657_v51, %v657_v51  ;;  %v662_v6 = vmul.f32 %v658_v4, %v658_v4 }
 0x2f7   :  { %v664_v35 = vsel %vm90_vm1, %v660_v61, 0.0  ;;  %v663_v37 = vsel %vm90_vm1, %v659_v62, 0.0  ;;  %v666_v42 = vsel %vm90_vm1, %v661_v25, 0.0  ;;  %v668_v0 = vsel %vm90_vm1, %v662_v6, 0.0 }
 0x2f8   :  { %v665_v40 = vadd.f32 %v664_v35, %v663_v37  ;;  %v2037_v62 = vmov 5  }
 0x2fa   :  { %v667_v20 = vadd.f32 %v666_v42, %v665_v40 }
 0x2fc   :  { %v669_v5 = vadd.f32 %v668_v0, %v667_v20 }
 0x2fe   :  { %v670_v30 = vrot.slane %v669_v5, 4 }
 0x300   :  { %v671_v3 = vadd.f32 %v670_v30, %v669_v5 }
 0x302   :  { %v672_v44 = vrot.slane %v671_v3, 2 }
 0x304   :  { %v673_v49 = vadd.f32 %v672_v44, %v671_v3 }
 0x306   :  { %v674_v63 = vrot.slane %v673_v49, 1 }
 0x308   :  { %v675_v2 = vadd.f32 %v674_v63, %v673_v49 }
 0x30a   :  { %v676_v57 = vmul.f32 0.03125, %v675_v2 }
 0x30c   :  { %v677_v14 = vadd.f32 1e-06, %v676_v57 }
 0x30e   :  { %1936 = vrsqrt.f32 %v677_v14 }
 0x318   :  { %v1937_v52 = vpop.eup %1936 }
 0x319   :  { %v679_v58 = vmul.f32 %v1937_v52, %v655_v50  ;;  %v680_v16 = vmul.f32 %v1937_v52, %v656_v15  ;;  %v681_v53 = vmul.f32 %v1937_v52, %v657_v51  ;;  %v682_v17 = vmul.f32 %v1937_v52, %v658_v4  ;;  %v2343_v15 = vld [vmem:[%s2597_s4 + $0x8] sm:$0xff]  ;;  %v739_v4 = vpop.permute.xlu1 %738  ;;  %v2349_v50 = vld [vmem:[%s2597_s4 + $0x10] sm:$0xff] }
 0x31a   :  { %1132 = vperm.xlu1 %1862, %v2343_v15  }
 0x31b   :  { %v699_v22 = vmul.f32 %v685_v56, %v679_v58  ;;  %v700_v54 = vmul.f32 %v689_v46, %v680_v16  ;;  %v701_v18 = vmul.f32 %v693_v27, %v681_v53  ;;  %v702_v23 = vmul.f32 %v697_v32, %v682_v17 }
 0x31d   :  { %v720_v60 = vadd.f32 %v709_v26, %v700_v54  ;;  %v719_v1 = vadd.f32 %v705_v8, %v699_v22  ;;  %v721_v24 = vadd.f32 %v713_v29, %v701_v18  ;;  %v722_v55 = vadd.f32 %v717_v21, %v702_v23  ;;  %v923_v51 = vpop.permute.xlu1 %922  ;;  %v2362_v26 = vld [vmem:[%s2597_s4 + $0x18] sm:$0xff] }
 0x31e   :  { %1136 = vperm.xlu1 %1862, %v2349_v50  }
 0x31f   :  { %v727_v19 = vpack.c.bf16 %v720_v60, %v719_v1  ;;  %v728_v28 = vpack.c.bf16 %v722_v55, %v721_v24 }
 0x321   :  { %1767 = vmatprep.subr.bf16.mxu1 %v727_v19  ;;  %v927_v61 = vpop.permute.xlu1 %926 }
 0x322   :  { %1768 = vmatpush3.bf16.msra.mxu1 %v727_v19  ;;  %1140 = vperm.xlu1 %1862, %v2101_v7  }
 0x323   :  { %1769 = vmatprep.subr.bf16.mxu1 %v728_v28 }
 0x325   :  { %v931_v25 = vpop.permute.xlu1 %930 }
 0x326   :  { %1770 = vmatpush3.bf16.msra.mxu1 %v728_v28  ;;  %1863 = vset.pattern.permute.xlu1 %v2036_v12 }
 0x327   :  { %1775 = vmatprep.subr.bf16.mxu1 %v822_v33  ;;  %1251 = vperm.xlu1 %1863, %v2336_v47  }
 0x329   :  { %1772 = vmatmul.mubr.msk.bf16.vlgmr.msra.gmra.mrb[4].mxu1 %vm226_vm0, %v1881_v34  ;;  %v935_v35 = vpop.permute.xlu1 %934 }
 0x32a   :  { %1776 = vmatpush3.bf16.msra.mxu1 %v822_v33  ;;  %1779 = vmatprep.mubr.msk.bf16.mxu1 %vm226_vm0, %v1882_v38 }
 0x32b   :  { %1777 = vmatprep.subr.bf16.mxu1 %v823_v39  ;;  %1255 = vperm.xlu1 %1863, %v2343_v15  }
 0x32d   :  { %v743_v7 = vpop.permute.xlu1 %742 }
 0x32e   :  { %1778 = vmatpush3.bf16.msra.mxu1 %v823_v39 }
 0x32f   :  { %1864 = vset.pattern.permute.xlu1 %v2037_v62 }
 0x330   :  { %1271 = vperm.xlu1 %1864, %v2336_v47  }
 0x331   :  { %1780 = vmatmul.mubr.msk.bf16.vlgmr.msra.gmra.mrb[8].mxu1 %vm226_vm0, %v1883_v13 }
 0x332   :  { %1783 = vmatprep.mubr.msk.bf16.mxu1 %vm226_vm0, %v1884_v11 }
 0x334   :  { %1275 = vperm.xlu1 %1864, %v2343_v15  }
 0x338   :  { %1865 = vset.pattern.permute.xlu1 %v2036_v12 }
 0x339   :  { %1784 = vmatmul.mubr.msk.bf16.gmra.mrb[12].mxu1 %vm226_vm0, %v1885_v41  ;;  %1259 = vperm.xlu1 %1865, %v2349_v50  }
 0x33d   :  { %1867 = vset.pattern.permute.xlu1 %v2037_v62 }
 0x33e   :  { %1279 = vperm.xlu1 %1867, %v2349_v50  }
 0x342   :  { %1283 = vperm.xlu1 %1867, %v2362_v26  }
 0x3fc   :  { %v1773_v6 = vpop.f32.mrb[4].mxu1 }
 0x3fd   :  { %v795_v37 = vpop.f32.mrb[5].mxu1  ;;  %v804_v20 = vadd.f32 %v1773_v6, %v739_v4 }
 0x3fe   :  { %v1774_v40 = vpop.f32.mrb[6].mxu1  ;;  %v796_v0 = vadd.f32 %v795_v37, %v731_v43 }
 0x3ff   :  { %v798_v42 = vpop.f32.mrb[7].mxu1  ;;  %v807_v5 = vadd.f32 %v1774_v40, %v743_v7  ;;  %v812_v3 = vmul.f32 0.35355338, %v804_v20 }
 0x400   :  { %v799_v30 = vadd.f32 %v798_v42, %v735_v48  ;;  %v810_v44 = vmul.f32 0.35355338, %v796_v0 }
 0x401   :  { %v813_v49 = vmul.f32 0.35355338, %v807_v5 }
 0x402   :  { %v811_v56 = vmul.f32 0.35355338, %v799_v30 }
 0x404   :  { %v1781_v46 = vpop.f32.mrb[8].mxu1 }
 0x405   :  { %v939_v63 = vadd.f32 %v1781_v46, %v931_v25  ;;  %v890_v2 = vpop.f32.mrb[9].mxu1 }
 0x406   :  { %v937_v8 = vadd.f32 %v923_v51, %v890_v2  ;;  %v1782_v57 = vpop.f32.mrb[10].mxu1 }
 0x407   :  { %v2365_v14 = vmul.f32 %v939_v63, %v810_v44  ;;  %v2367_v27 = vmul.f32 %v939_v63, %v811_v56  ;;  %v2369_v29 = vmul.f32 %v939_v63, %v812_v3  ;;  %v2371_v32 = vmul.f32 %v939_v63, %v813_v49  ;;  %v893_v9 = vpop.f32.mrb[11].mxu1 }
 0x408   :  { %v2373_v52 = vmul.f32 %v937_v8, %v810_v44  ;;  %v2375_v58 = vmul.f32 %v937_v8, %v811_v56  ;;  %v1041_v16 = vmul.f32 %v937_v8, %v812_v3  ;;  %v2377_v53 = vmul.f32 %v937_v8, %v813_v49 }
 0x409   :  { %v967_v17 = vsel %vm90_vm1, %v2365_v14, -inf  ;;  %v1007_v21 = vsel %vm90_vm1, %v2367_v27, -inf  ;;  %v1047_v59 = vsel %vm90_vm1, %v2369_v29, -inf  ;;  %v1087_v22 = vsel %vm90_vm1, %v2371_v32, -inf }
 0x40a   :  { %v940_v54 = vadd.f32 %v1782_v57, %v935_v35  ;;  %v938_v18 = vadd.f32 %v927_v61, %v893_v9  ;;  %v965_v23 = vsel %vm90_vm1, %v2373_v52, -inf  ;;  %v1005_v60 = vsel %vm90_vm1, %v2375_v58, -inf }
 0x40b   :  { %v1045_v1 = vsel %vm90_vm1, %v1041_v16, -inf  ;;  %v1085_v24 = vsel %vm90_vm1, %v2377_v53, -inf }
 0x40c   :  { %v2394_v55 = vpop.f32.mrb[12].mxu1  ;;  %v2396_v19 = vmul.f32 %v940_v54, %v810_v44  ;;  %v2398_v28 = vmul.f32 %v940_v54, %v811_v56  ;;  %v1044_v31 = vmul.f32 %v940_v54, %v812_v3  ;;  %v1084_v33 = vmul.f32 %v940_v54, %v813_v49 }
 0x40d   :  { %v2400_v34 = vpop.f32.mrb[13].mxu1  ;;  %v962_v36 = vmul.f32 %v938_v18, %v810_v44  ;;  %v1002_v38 = vmul.f32 %v938_v18, %v811_v56  ;;  %v1042_v39 = vmul.f32 %v938_v18, %v812_v3  ;;  %v1082_v13 = vmul.f32 %v938_v18, %v813_v49 }
 0x40e   :  { %v2402_v11 = vpop.f32.mrb[14].mxu1  ;;  %v968_v41 = vsel %vm90_vm1, %v2396_v19, -inf  ;;  %v1008_v10 = vsel %vm90_vm1, %v2398_v28, -inf  ;;  %v1048_v43 = vsel %vm90_vm1, %v1044_v31, -inf  ;;  %v1088_v45 = vsel %vm90_vm1, %v1084_v33, -inf }
 0x40f   :  { %v2410_v12 = vpop.f32.mrb[15].mxu1  ;;  %v970_v48 = vmax.f32 %v967_v17, %v968_v41  ;;  %v1010_v4 = vmax.f32 %v1007_v21, %v1008_v10  ;;  %v1050_v51 = vmax.f32 %v1047_v59, %v1048_v43  ;;  %v1090_v61 = vmax.f32 %v1087_v22, %v1088_v45 }
 0x410   :  { %v966_v62 = vsel %vm90_vm1, %v962_v36, -inf  ;;  %v1006_v25 = vsel %vm90_vm1, %v1002_v38, -inf  ;;  %v1046_v35 = vsel %vm90_vm1, %v1042_v39, -inf  ;;  %v1086_v6 = vsel %vm90_vm1, %v1082_v13, -inf }
 0x411   :  { %v969_v37 = vmax.f32 %v965_v23, %v966_v62  ;;  %v1009_v7 = vmax.f32 %v1005_v60, %v1006_v25  ;;  %v1049_v40 = vmax.f32 %v1045_v1, %v1046_v35  ;;  %v1089_v42 = vmax.f32 %v1085_v24, %v1086_v6  ;;  %v947_v6 = vpop.permute.xlu1 %946 }
 0x413   :  { %v971_v20 = vmax.f32 %v969_v37, %v970_v48  ;;  %v1011_v0 = vmax.f32 %v1009_v7, %v1010_v4  ;;  %v1051_v5 = vmax.f32 %v1049_v40, %v1050_v51  ;;  %v1091_v30 = vmax.f32 %v1089_v42, %v1090_v61 }
 0x415   :  { %v972_v3 = vsub.f32 %v2373_v52, %v971_v20  ;;  %v973_v44 = vsub.f32 %v962_v36, %v971_v20  ;;  %v974_v46 = vsub.f32 %v2365_v14, %v971_v20  ;;  %v975_v49 = vsub.f32 %v2396_v19, %v971_v20 }
 0x416   :  { %v1012_v56 = vsub.f32 %v2375_v58, %v1011_v0  ;;  %v1013_v63 = vsub.f32 %v1002_v38, %v1011_v0  ;;  %v1014_v2 = vsub.f32 %v2367_v27, %v1011_v0  ;;  %v1015_v8 = vsub.f32 %v2398_v28, %v1011_v0 }
 0x417   :  { %v978_v57 = vmul.f32 1.442695, %v973_v44  ;;  %v1052_v9 = vsub.f32 %v1041_v16, %v1051_v5  ;;  %v1053_v17 = vsub.f32 %v1042_v39, %v1051_v5  ;;  %v1054_v21 = vsub.f32 %v2369_v29, %v1051_v5 }
 0x418   :  { %v1018_v59 = vmul.f32 1.442695, %v1013_v63  ;;  %v1055_v22 = vsub.f32 %v1044_v31, %v1051_v5  ;;  %v1092_v52 = vsub.f32 %v2377_v53, %v1091_v30  ;;  %v1093_v54 = vsub.f32 %v1082_v13, %v1091_v30 }
 0x419   :  { %1938 = vpow2.f32 %v978_v57  ;;  %v1056_v14 = vmul.f32 1.442695, %v1052_v9  ;;  %v1058_v18 = vmul.f32 1.442695, %v1053_v17  ;;  %v1060_v23 = vmul.f32 1.442695, %v1054_v21  ;;  %v951_v21 = vpop.permute.xlu1 %950 }
 0x41a   :  { %1940 = vpow2.f32 %v1018_v59  ;;  %v1062_v58 = vmul.f32 1.442695, %v1055_v22  ;;  %v1094_v27 = vsub.f32 %v2371_v32, %v1091_v30  ;;  %v1095_v60 = vsub.f32 %v1084_v33, %v1091_v30 }
 0x41b   :  { %1942 = vpow2.f32 %v1056_v14  ;;  %v1096_v1 = vmul.f32 1.442695, %v1092_v52  ;;  %v1098_v16 = vmul.f32 1.442695, %v1093_v54  ;;  %v1016_v53 = vmul.f32 1.442695, %v1012_v56 }
 0x41c   :  { %1944 = vpow2.f32 %v1058_v18  ;;  %v1100_v29 = vmul.f32 1.442695, %v1094_v27  ;;  %v1102_v24 = vmul.f32 1.442695, %v1095_v60  ;;  %v1020_v19 = vmul.f32 1.442695, %v1014_v2 }
 0x41d   :  { %1946 = vpow2.f32 %v1060_v23  ;;  %v1022_v28 = vmul.f32 1.442695, %v1015_v8  ;;  %v976_v31 = vmul.f32 1.442695, %v972_v3  ;;  %v980_v32 = vmul.f32 1.442695, %v974_v46 }
 0x41e   :  { %1948 = vpow2.f32 %v1062_v58  ;;  %v982_v38 = vmul.f32 1.442695, %v975_v49 }
 0x41f   :  { %1950 = vpow2.f32 %v1096_v1  ;;  %v959_v1 = vadd.f32 %v2394_v55, %v951_v21  ;;  %v1302_v21 = vld [vmem:[%s2597_s4 + $0x10] sm:$0xff] }
 0x420   :  { %1952 = vpow2.f32 %v1098_v16  ;;  %v955_v16 = vpop.permute.xlu1 %954 }
 0x421   :  { %1954 = vpow2.f32 %v1100_v29 }
 0x422   :  { %1956 = vpow2.f32 %v1102_v24 }
 0x423   :  { %v2425_v36 = vpop.eup %1938  ;;  %1958 = vpow2.f32 %v1016_v53  ;;  %v960_v53 = vadd.f32 %v2402_v11, %v955_v16 }
 0x424   :  { %v2427_v33 = vpop.eup %1940  ;;  %1960 = vpow2.f32 %v1020_v19  ;;  %v985_v2 = vsel %vm90_vm1, %v2425_v36, 0.0 }
 0x425   :  { %v1943_v39 = vpop.eup %1942  ;;  %1962 = vpow2.f32 %v1022_v28  ;;  %v1025_v0 = vsel %vm90_vm1, %v2427_v33, 0.0 }
 0x426   :  { %v1945_v13 = vpop.eup %1944  ;;  %v1064_v41 = vsel %vm90_vm1, %v1943_v39, 0.0  ;;  %1964 = vpow2.f32 %v976_v31 }
 0x427   :  { %v1947_v10 = vpop.eup %1946  ;;  %v1065_v43 = vsel %vm90_vm1, %v1945_v13, 0.0  ;;  %1966 = vpow2.f32 %v980_v32 }
 0x428   :  { %v1949_v45 = vpop.eup %1948  ;;  %v1066_v48 = vadd.f32 %v1065_v43, %v1064_v41  ;;  %1968 = vpow2.f32 %v982_v38  ;;  %v1067_v51 = vsel %vm90_vm1, %v1947_v10, 0.0  ;;  %v958_v43 = vadd.f32 %v947_v6, %v2410_v12 }
 0x429   :  { %v1951_v4 = vpop.eup %1950  ;;  %v1069_v37 = vsel %vm90_vm1, %v1949_v45, 0.0 }
 0x42a   :  { %v1953_v61 = vpop.eup %1952  ;;  %v1068_v62 = vadd.f32 %v1067_v51, %v1066_v48  ;;  %v1104_v25 = vsel %vm90_vm1, %v1951_v4, 0.0  ;;  %v943_v48 = vpop.permute.xlu0 %942 }
 0x42b   :  { %v1955_v35 = vpop.eup %1954  ;;  %v1105_v7 = vsel %vm90_vm1, %v1953_v61, 0.0 }
 0x42c   :  { %v1957_v40 = vpop.eup %1956  ;;  %v1070_v42 = vadd.f32 %v1069_v37, %v1068_v62  ;;  %v1106_v20 = vadd.f32 %v1105_v7, %v1104_v25  ;;  %v1107_v30 = vsel %vm90_vm1, %v1955_v35, 0.0 }
 0x42d   :  { %v1959_v5 = vpop.eup %1958  ;;  %v1109_v56 = vsel %vm90_vm1, %v1957_v40, 0.0 }
 0x42e   :  { %v1961_v3 = vpop.eup %1960  ;;  %1970 = vrcp.f32 %v1070_v42  ;;  %v1108_v44 = vadd.f32 %v1107_v30, %v1106_v20  ;;  %v1024_v46 = vsel %vm90_vm1, %v1959_v5, 0.0  ;;  %v957_v42 = vadd.f32 %v943_v48, %v2400_v34 }
 0x42f   :  { %v1963_v49 = vpop.eup %1962  ;;  %v1026_v63 = vadd.f32 %v1025_v0, %v1024_v46  ;;  %v1027_v9 = vsel %vm90_vm1, %v1961_v3, 0.0 }
 0x430   :  { %v1965_v8 = vpop.eup %1964  ;;  %v1110_v57 = vadd.f32 %v1109_v56, %v1108_v44  ;;  %v1029_v54 = vsel %vm90_vm1, %v1963_v49, 0.0 }
 0x431   :  { %v1967_v17 = vpop.eup %1966  ;;  %v1028_v59 = vadd.f32 %v1027_v9, %v1026_v63  ;;  %v984_v22 = vsel %vm90_vm1, %v1965_v8, 0.0  ;;  %v1300_v9 = vld [vmem:[%s2597_s4] sm:$0xff] }
 0x432   :  { %v1969_v52 = vpop.eup %1968  ;;  %1972 = vrcp.f32 %v1110_v57  ;;  %v986_v14 = vadd.f32 %v985_v2, %v984_v22  ;;  %v987_v23 = vsel %vm90_vm1, %v1967_v17, 0.0  ;;  %v1301_v57 = vld [vmem:[%s2597_s4 + $0x8] sm:$0xff]  ;;  %v1304_v22 = vld [vmem:[%s2597_s4 + $0x20] sm:$0xff] }
 0x433   :  { %v1030_v18 = vadd.f32 %v1029_v54, %v1028_v59  ;;  %v989_v27 = vsel %vm90_vm1, %v1969_v52, 0.0  ;;  %v1303_v59 = vld [vmem:[%s2597_s4 + $0x18] sm:$0xff]  ;;  %v1306_v54 = vld [vmem:[%s2597_s4 + $0x30] sm:$0xff] }
 0x434   :  { %v988_v58 = vadd.f32 %v987_v23, %v986_v14  ;;  %v1307_v14 = vld [vmem:[%s2597_s4 + $0x38] sm:$0xff] }
 0x435   :  { %1974 = vrcp.f32 %v1030_v18  ;;  %v1129_v18 = vpop.permute.xlu1 %1128 }
 0x436   :  { %v990_v60 = vadd.f32 %v989_v27, %v988_v58 }
 0x438   :  { %v1971_v29 = vpop.eup %1970  ;;  %1976 = vrcp.f32 %v990_v60 }
 0x439   :  { %v1072_v24 = vmul.f32 %v1971_v29, %v959_v1  ;;  %v1133_v23 = vpop.permute.xlu1 %1132 }
 0x43b   :  { %v1073_v19 = vmul.f32 %v1943_v39, %v1072_v24  ;;  %v1074_v28 = vmul.f32 %v1945_v13, %v1072_v24  ;;  %v1075_v31 = vmul.f32 %v1947_v10, %v1072_v24  ;;  %v1076_v32 = vmul.f32 %v1949_v45, %v1072_v24 }
 0x43c   :  { %v1973_v38 = vpop.eup %1972 }
 0x43d   :  { %v1112_v41 = vmul.f32 %v1973_v38, %v960_v53  ;;  %v1137_v58 = vpop.permute.xlu1 %1136 }
 0x43f   :  { %v1975_v51 = vpop.eup %1974  ;;  %v1113_v62 = vmul.f32 %v1951_v4, %v1112_v41  ;;  %v1114_v25 = vmul.f32 %v1953_v61, %v1112_v41  ;;  %v1115_v37 = vmul.f32 %v1955_v35, %v1112_v41  ;;  %v1116_v55 = vmul.f32 %v1957_v40, %v1112_v41 }
 0x440   :  { %v1032_v7 = vmul.f32 %v1975_v51, %v958_v43 }
 0x442   :  { %v1977_v20 = vpop.eup %1976  ;;  %v1033_v0 = vmul.f32 %v1959_v5, %v1032_v7  ;;  %v1034_v11 = vmul.f32 %v2427_v33, %v1032_v7  ;;  %v1035_v39 = vmul.f32 %v1961_v3, %v1032_v7  ;;  %v1036_v13 = vmul.f32 %v1963_v49, %v1032_v7 }
 0x443   :  { %v992_v10 = vmul.f32 %v1977_v20, %v957_v42 }
 0x445   :  { %v993_v45 = vmul.f32 %v1965_v8, %v992_v10  ;;  %v994_v30 = vmul.f32 %v2425_v36, %v992_v10  ;;  %v995_v12 = vmul.f32 %v1967_v17, %v992_v10  ;;  %v996_v6 = vmul.f32 %v1969_v52, %v992_v10  ;;  %v1887_v36 = vld [vmem:[%s2595_s2 + $0x78] sm:$0xff]   ;;  %v1888_v8 = vld [vmem:[%s2595_s2 + $0x80] sm:$0xff]   ;;  %v1305_v52 = vld [vmem:[%s2597_s4 + $0x28] sm:$0xff] }
 0x446   :  { %v2038_v17 = vmov 15  }
 0x447   :  { %v1037_v44 = vadd.f32 %v1033_v0, %v993_v45  ;;  %v1038_v4 = vadd.f32 %v1034_v11, %v994_v30  ;;  %v1039_v61 = vadd.f32 %v1035_v39, %v995_v12  ;;  %v1040_v35 = vadd.f32 %v1036_v13, %v996_v6  ;;  %1869 = vset.pattern.permute.xlu1 %v2038_v17 }
 0x448   :  { %1868 = vset.pattern.permute.xlu0 %v2038_v17  ;;  %1315 = vperm.xlu1 %1869, %v1301_v57  }
 0x449   :  { %v1077_v40 = vadd.f32 %v1073_v19, %v1037_v44  ;;  %v1078_v46 = vadd.f32 %v1074_v28, %v1038_v4  ;;  %v1079_v56 = vadd.f32 %v1075_v31, %v1039_v61  ;;  %v1080_v34 = vadd.f32 %v1076_v32, %v1040_v35  ;;  %1310 = vperm.xlu0 %1868, %v1300_v9   ;;  %v1141_v19 = vpop.permute.xlu1 %1140 }
 0x44b   :  { %v1117_v63 = vadd.f32 %v1113_v62, %v1077_v40  ;;  %v1118_v5 = vadd.f32 %v1114_v25, %v1078_v46  ;;  %v1119_v2 = vadd.f32 %v1115_v37, %v1079_v56  ;;  %v1120_v33 = vadd.f32 %v1116_v55, %v1080_v34 }
 0x44c   :  { %1320 = vperm.xlu1 %1869, %v1302_v21  }
 0x44d   :  { %v1125_v3 = vpack.c.bf16 %v1118_v5, %v1117_v63  ;;  %v1126_v49 = vpack.c.bf16 %v1120_v33, %v1119_v2  ;;  %1325 = vperm.xlu0 %1868, %v1303_v59   ;;  %v1252_v4 = vpop.permute.xlu1 %1251 }
 0x44f   :  { %1787 = vmatprep.subr.bf16.mxu0 %v1125_v3 }
 0x450   :  { %1788 = vmatpush3.bf16.msra.mxu0 %v1125_v3  ;;  %1330 = vperm.xlu1 %1869, %v1304_v22   ;;  %v1264_v22 = vpop.permute.xlu0 %1263 }
 0x451   :  { %1789 = vmatprep.subr.bf16.mxu0 %v1126_v49  ;;  %1335 = vperm.xlu0 %1868, %v1305_v52   ;;  %v1256_v63 = vpop.permute.xlu1 %1255 }
 0x454   :  { %1790 = vmatpush3.bf16.msra.mxu0 %v1126_v49  ;;  %1340 = vperm.xlu1 %1869, %v1306_v54  }
 0x455   :  { %1345 = vperm.xlu0 %1868, %v1307_v14   ;;  %v1272_v3 = vpop.permute.xlu1 %1271 }
 0x457   :  { %1792 = vmatmul.mubr.msk.bf16.vlgmr.msra.gmra.mrb[12].mxu0 %vm226_vm0, %v1887_v36 }
 0x458   :  { %1799 = vmatprep.mubr.msk.bf16.mxu0 %vm226_vm0, %v1888_v8 }
 0x459   :  { %v1276_v57 = vpop.permute.xlu1 %1275 }
 0x45d   :  { %v1260_v17 = vpop.permute.xlu1 %1259 }
 0x461   :  { %v1280_v21 = vpop.permute.xlu1 %1279 }
 0x52a   :  { %v1793_v27 = vpop.f32.mrb[12].mxu0 }
 0x52b   :  { %v1193_v60 = vpop.f32.mrb[13].mxu0  ;;  %v2487_v24 = vadd.f32 %v1793_v27, %v1137_v58 }
 0x52c   :  { %v2485_v1 = vadd.f32 %v1193_v60, %v1129_v18  ;;  %v1794_v16 = vpop.f32.mrb[14].mxu0 }
 0x52d   :  { %v1196_v29 = vpop.f32.mrb[15].mxu0  ;;  %v2495_v32 = vadd.f32 %v1794_v16, %v1141_v19  ;;  %v1211_v41 = vsel %vm90_vm1, %v2487_v24, 0.0 }
 0x52e   :  { %v2489_v53 = vadd.f32 %v1196_v29, %v1133_v23  ;;  %v1208_v28 = vsel %vm90_vm1, %v2485_v1, 0.0  ;;  %v1284_v23 = vpop.permute.xlu1 %1283 }
 0x52f   :  { %v1213_v48 = vsel %vm90_vm1, %v2495_v32, 0.0 }
 0x530   :  { %v1209_v31 = vsel %vm90_vm1, %v2489_v53, 0.0 }
 0x531   :  { %v1210_v38 = vadd.f32 %v1209_v31, %v1208_v28 }
 0x533   :  { %v1212_v43 = vadd.f32 %v1211_v41, %v1210_v38 }
 0x535   :  { %v1214_v51 = vadd.f32 %v1213_v48, %v1212_v43  ;;  %v1889_v43 = vld [vmem:[%s2595_s2 + $0x88] sm:$0xff]   ;;  %v1890_v48 = vld [vmem:[%s2595_s2 + $0x90] sm:$0xff]  }
 0x537   :  { %v1215_v62 = vrot.slane %v1214_v51, 4 }
 0x539   :  { %v1216_v25 = vadd.f32 %v1215_v62, %v1214_v51  ;;  %v1891_v51 = vld [vmem:[%s2595_s2 + $0x98] sm:$0xff]   ;;  %v1892_v62 = vld [vmem:[%s2596_s3] sm:$0xff]  }
 0x53a   :  { %1815 = vmatprep.mubr.msk.bf16.mxu1 %vm1551_vm2, %v1892_v62 }
 0x53b   :  { %v1217_v37 = vrot.slane %v1216_v25, 2 }
 0x53d   :  { %v1218_v55 = vadd.f32 %v1217_v37, %v1216_v25  ;;  %v2039_v25 = vmov 14   ;;  %v1316_v37 = vpop.permute.xlu1 %1315 }
 0x53e   :  { %1870 = vset.pattern.permute.xlu1 %v2039_v25  ;;  %1871 = vset.pattern.permute.xlu0 %v2039_v25 }
 0x53f   :  { %v1219_v7 = vrot.slane %v1218_v55, 1  ;;  %1526 = vperm.xlu1 %1870, %v2336_v47   ;;  %1530 = vperm.xlu0 %1871, %v2343_v15  }
 0x541   :  { %v1220_v42 = vadd.f32 %v1219_v7, %v1218_v55  ;;  %v1311_v55 = vpop.permute.xlu0 %1310  ;;  %v1321_v7 = vpop.permute.xlu1 %1320 }
 0x543   :  { %v1221_v20 = vmul.f32 0.03125, %v1220_v42  ;;  %1534 = vperm.xlu1 %1870, %v2349_v50  }
 0x545   :  { %v1223_v0 = vsub.f32 %v2489_v53, %v1221_v20  ;;  %v1224_v11 = vsub.f32 %v2487_v24, %v1221_v20  ;;  %v1225_v39 = vsub.f32 %v2495_v32, %v1221_v20  ;;  %v1222_v13 = vsub.f32 %v2485_v1, %v1221_v20  ;;  %v1326_v42 = vpop.permute.xlu0 %1325 }
 0x547   :  { %v1226_v10 = vmul.f32 %v1222_v13, %v1222_v13  ;;  %v1227_v45 = vmul.f32 %v1223_v0, %v1223_v0  ;;  %v1228_v30 = vmul.f32 %v1224_v11, %v1224_v11  ;;  %v1229_v12 = vmul.f32 %v1225_v39, %v1225_v39  ;;  %1538 = vperm.xlu1 %1870, %v2362_v26  }
 0x549   :  { %v1230_v6 = vsel %vm90_vm1, %v1226_v10, 0.0  ;;  %v1231_v44 = vsel %vm90_vm1, %v1227_v45, 0.0  ;;  %v1233_v35 = vsel %vm90_vm1, %v1228_v30, 0.0  ;;  %v1235_v46 = vsel %vm90_vm1, %v1229_v12, 0.0  ;;  %v1331_v10 = vpop.permute.xlu1 %1330  ;;  %v1336_v30 = vpop.permute.xlu0 %1335 }
 0x54a   :  { %v1232_v61 = vadd.f32 %v1231_v44, %v1230_v6 }
 0x54c   :  { %v1234_v40 = vadd.f32 %v1233_v35, %v1232_v61 }
 0x54e   :  { %v1236_v56 = vadd.f32 %v1235_v46, %v1234_v40 }
 0x550   :  { %v1237_v34 = vrot.slane %v1236_v56, 4 }
 0x552   :  { %v1238_v5 = vadd.f32 %v1237_v34, %v1236_v56  ;;  %v1341_v56 = vpop.permute.xlu1 %1340 }
 0x554   :  { %v1239_v2 = vrot.slane %v1238_v5, 2 }
 0x556   :  { %v1240_v33 = vadd.f32 %v1239_v2, %v1238_v5 }
 0x558   :  { %v1241_v49 = vrot.slane %v1240_v33, 1 }
 0x55a   :  { %v1242_v36 = vadd.f32 %v1241_v49, %v1240_v33 }
 0x55c   :  { %v1243_v8 = vmul.f32 0.03125, %v1242_v36 }
 0x55e   :  { %v1244_v9 = vadd.f32 1e-06, %v1243_v8  ;;  %v1346_v8 = vpop.permute.xlu0 %1345 }
 0x560   :  { %1978 = vrsqrt.f32 %v1244_v9 }
 0x56a   :  { %v1979_v59 = vpop.eup %1978 }
 0x56b   :  { %v1246_v52 = vmul.f32 %v1979_v59, %v1222_v13  ;;  %v1247_v54 = vmul.f32 %v1979_v59, %v1223_v0  ;;  %v1248_v14 = vmul.f32 %v1979_v59, %v1224_v11  ;;  %v1249_v18 = vmul.f32 %v1979_v59, %v1225_v39 }
 0x56d   :  { %v1266_v58 = vmul.f32 %v1252_v4, %v1246_v52  ;;  %v1267_v27 = vmul.f32 %v1256_v63, %v1247_v54  ;;  %v1268_v60 = vmul.f32 %v1260_v17, %v1248_v14  ;;  %v1269_v16 = vmul.f32 %v1264_v22, %v1249_v18 }
 0x56f   :  { %v1286_v29 = vadd.f32 %v1272_v3, %v1266_v58  ;;  %v1287_v19 = vadd.f32 %v1276_v57, %v1267_v27  ;;  %v1288_v28 = vadd.f32 %v1280_v21, %v1268_v60  ;;  %v1289_v31 = vadd.f32 %v1284_v23, %v1269_v16 }
 0x571   :  { %v1298_v38 = vpack.c.bf16 %v1287_v19, %v1286_v29  ;;  %v1299_v41 = vpack.c.bf16 %v1289_v31, %v1288_v28 }
 0x573   :  { %1795 = vmatprep.subr.bf16.mxu0 %v1298_v38 }
 0x574   :  { %1796 = vmatpush3.bf16.msra.mxu0 %v1298_v38 }
 0x575   :  { %1797 = vmatprep.subr.bf16.mxu0 %v1299_v41 }
 0x578   :  { %1798 = vmatpush3.bf16.msra.mxu0 %v1299_v41 }
 0x57b   :  { %1800 = vmatmul.mubr.msk.bf16.vlgmr.msra.gmra.mrb[16].mxu0 %vm226_vm0, %v1889_v43 }
 0x57c   :  { %1803 = vmatprep.mubr.msk.bf16.mxu0 %vm226_vm0, %v1890_v48 }
 0x583   :  { %1804 = vmatmul.mubr.msk.bf16.gmra.mrb[20].mxu0 %vm226_vm0, %v1891_v51 }
 0x64e   :  { %v1801_v20 = vpop.f32.mrb[16].mxu0 }
 0x64f   :  { %v2529_v0 = vadd.f32 %v1801_v20, %v1321_v7  ;;  %v1414_v11 = vpop.f32.mrb[17].mxu0 }
 0x650   :  { %v2531_v39 = vadd.f32 %v1414_v11, %v1311_v55  ;;  %v1802_v13 = vpop.f32.mrb[18].mxu0 }
 0x651   :  { %v1455_v47 = vmul.f32 0.044715, %v2529_v0  ;;  %v2534_v45 = vadd.f32 %v1802_v13, %v1326_v42  ;;  %v1417_v15 = vpop.f32.mrb[19].mxu0 }
 0x652   :  { %v1453_v50 = vmul.f32 0.044715, %v2531_v39  ;;  %v2537_v26 = vadd.f32 %v1417_v15, %v1316_v37 }
 0x653   :  { %v1463_v12 = vmul.f32 %v1455_v47, %v2529_v0  ;;  %v1456_v6 = vmul.f32 0.044715, %v2534_v45 }
 0x654   :  { %v1461_v44 = vmul.f32 %v1453_v50, %v2531_v39  ;;  %v1454_v4 = vmul.f32 0.044715, %v2537_v26  ;;  %v1447_v50 = vmul.f32 0.5, %v2529_v0 }
 0x655   :  { %v1471_v61 = vmul.f32 %v1463_v12, %v2529_v0  ;;  %v1464_v35 = vmul.f32 %v1456_v6, %v2534_v45  ;;  %v1445_v6 = vmul.f32 0.5, %v2531_v39 }
 0x656   :  { %v1469_v40 = vmul.f32 %v1461_v44, %v2531_v39  ;;  %v1462_v46 = vmul.f32 %v1454_v4, %v2537_v26  ;;  %v1805_v34 = vpop.f32.mrb[20].mxu0  ;;  %v1446_v44 = vmul.f32 0.5, %v2537_v26 }
 0x657   :  { %v1472_v63 = vmul.f32 %v1464_v35, %v2534_v45  ;;  %v2548_v5 = vadd.f32 %v1805_v34, %v1341_v56  ;;  %v1430_v2 = vpop.f32.mrb[21].mxu0  ;;  %v1479_v33 = vadd.f32 %v1471_v61, %v2529_v0 }
 0x658   :  { %v1470_v3 = vmul.f32 %v1462_v46, %v2537_v26  ;;  %v2552_v49 = vadd.f32 %v1430_v2, %v1331_v10  ;;  %v1806_v36 = vpop.f32.mrb[22].mxu0  ;;  %v1477_v57 = vadd.f32 %v1469_v40, %v2531_v39 }
 0x659   :  { %v1459_v9 = vmul.f32 0.044715, %v2548_v5  ;;  %v1442_v17 = vadd.f32 %v1806_v36, %v1346_v8  ;;  %v1433_v21 = vpop.f32.mrb[23].mxu0  ;;  %v1480_v59 = vadd.f32 %v1472_v63, %v2534_v45  ;;  %v1487_v22 = vmul.f32 0.7978846, %v1479_v33 }
 0x65a   :  { %v1457_v52 = vmul.f32 0.044715, %v2552_v49  ;;  %v1434_v54 = vadd.f32 %v1433_v21, %v1336_v30  ;;  %v1478_v14 = vadd.f32 %v1470_v3, %v2537_v26  ;;  %v1485_v18 = vmul.f32 0.7978846, %v1477_v57 }
 0x65b   :  { %v1467_v23 = vmul.f32 %v1459_v9, %v2548_v5  ;;  %v1460_v58 = vmul.f32 0.044715, %v1442_v17  ;;  %v1488_v27 = vmul.f32 0.7978846, %v1480_v59  ;;  %1980 = vtanh.f32 %v1487_v22 }
 0x65c   :  { %v1465_v60 = vmul.f32 %v1457_v52, %v2552_v49  ;;  %v1458_v16 = vmul.f32 0.044715, %v1434_v54  ;;  %v1486_v29 = vmul.f32 0.7978846, %v1478_v14  ;;  %1982 = vtanh.f32 %v1485_v18 }
 0x65d   :  { %v1475_v19 = vmul.f32 %v1467_v23, %v2548_v5  ;;  %v1468_v28 = vmul.f32 %v1460_v58, %v1442_v17  ;;  %1984 = vtanh.f32 %v1488_v27  ;;  %v1448_v30 = vmul.f32 0.5, %v2534_v45  ;;  %v1531_v23 = vpop.permute.xlu0 %1530 }
 0x65e   :  { %v1473_v31 = vmul.f32 %v1465_v60, %v2552_v49  ;;  %v1466_v38 = vmul.f32 %v1458_v16, %v1434_v54  ;;  %1986 = vtanh.f32 %v1486_v29  ;;  %v1451_v45 = vmul.f32 0.5, %v2548_v5 }
 0x65f   :  { %v1476_v41 = vmul.f32 %v1468_v28, %v1442_v17  ;;  %v1483_v43 = vadd.f32 %v1475_v19, %v2548_v5  ;;  %v1452_v39 = vmul.f32 0.5, %v1442_v17  ;;  %v1449_v26 = vmul.f32 0.5, %v2552_v49  ;;  %v1893_v5 = vld [vmem:[%s2596_s3 + $0x8] sm:$0xff]   ;;  %s2040_s3 = smov [#allocation2]  }
 0x660   :  { %v1474_v48 = vmul.f32 %v1466_v38, %v1434_v54  ;;  %v1481_v51 = vadd.f32 %v1473_v31, %v2552_v49  ;;  %v1450_v57 = vmul.f32 0.5, %v1434_v54  ;;  %v1527_v49 = vpop.permute.xlu1 %1526  ;;  %s1650_s20 = sshll.u32 %s2040_s3, 4  ;;  %s1651_s20 = int_to_ptr.vmem [resolvable:$true] %s1650_s20 }
 0x661   :  { %v1484_v62 = vadd.f32 %v1476_v41, %v1442_v17  ;;  %v1491_v25 = vmul.f32 0.7978846, %v1483_v43  ;;  %s2000_s21 = scalar_lea.vmem %s1651_s20, 256  ;;  %p2005_p1 = scmp.lt.s32.totalorder %s1651_s20, %s1651_s20 }
 0x662   :  { %v1482_v37 = vadd.f32 %v1474_v48, %v1434_v54  ;;  %v1489_v55 = vmul.f32 0.7978846, %v1481_v51  ;;  %p2001_p0 = scmp.ne.s32.totalorder %s1651_s20, %s2000_s21  ;;  %p2006_p2 = scmp.lt.s32.totalorder %s2000_s21, %s2000_s21 }
 0x663   :  { %v1492_v7 = vmul.f32 0.7978846, %v1484_v62  ;;  %1988 = vtanh.f32 %v1491_v25 }
 0x664   :  { %v1490_v42 = vmul.f32 0.7978846, %v1482_v37  ;;  %1990 = vtanh.f32 %v1489_v55  ;;  %v1535_v60 = vpop.permute.xlu1 %1534  ;;  %p2007_p3 = por %p2006_p2, %p2005_p1 }
 0x665   :  { %v1981_v20 = vpop.eup %1980  ;;  %1992 = vtanh.f32 %v1492_v7 }
 0x666   :  { %v1983_v11 = vpop.eup %1982  ;;  %v1503_v13 = vadd.f32 1.0, %v1981_v20  ;;  %1994 = vtanh.f32 %v1490_v42  ;;  %p2008_p4 = pnand %p2007_p3, %p2001_p0 }
 0x667   :  { %v1985_v10 = vpop.eup %1984  ;;  %v1501_v47 = vadd.f32 1.0, %v1983_v11 }
 0x668   :  { %v1987_v15 = vpop.eup %1986  ;;  %v1504_v12 = vadd.f32 1.0, %v1985_v10  ;;  %v1511_v61 = vmul.f32 %v1503_v13, %v1447_v50  ;;  %v1539_v38 = vpop.permute.xlu1 %1538 }
 0x669   :  { %v1502_v4 = vadd.f32 1.0, %v1987_v15  ;;  %v1509_v40 = vmul.f32 %v1501_v47, %v1445_v6 }
 0x66a   :  { %v1512_v35 = vmul.f32 %v1504_v12, %v1448_v30 }
 0x66b   :  { %v1510_v46 = vmul.f32 %v1502_v4, %v1446_v44 }
 0x66c   :  { %v1522_v56 = vpack.c.bf16 %v1512_v35, %v1511_v61 }
 0x66d   :  { %v1989_v34 = vpop.eup %1988  ;;  %v1521_v63 = vpack.c.bf16 %v1510_v46, %v1509_v40 }
 0x66e   :  { %v1991_v2 = vpop.eup %1990  ;;  %v1507_v33 = vadd.f32 1.0, %v1989_v34 }
 0x66f   :  { %v1993_v3 = vpop.eup %1992  ;;  %1807 = vmatprep.subr.bf16.mxu1 %v1521_v63  ;;  %v1505_v0 = vadd.f32 1.0, %v1991_v2 }
 0x670   :  { %v1995_v36 = vpop.eup %1994  ;;  %1808 = vmatpush3.bf16.msra.mxu1 %v1521_v63  ;;  %v1508_v8 = vadd.f32 1.0, %v1993_v3  ;;  %v1515_v21 = vmul.f32 %v1507_v33, %v1451_v45 }
 0x671   :  { %1809 = vmatprep.subr.bf16.mxu1 %v1522_v56  ;;  %v1506_v9 = vadd.f32 1.0, %v1995_v36  ;;  %v1513_v22 = vmul.f32 %v1505_v0, %v1449_v26 }
 0x672   :  { %v1516_v59 = vmul.f32 %v1508_v8, %v1452_v39 }
 0x673   :  { %v1514_v52 = vmul.f32 %v1506_v9, %v1450_v57 }
 0x674   :  { %1810 = vmatpush3.bf16.msra.mxu1 %v1522_v56  ;;  %v1524_v14 = vpack.c.bf16 %v1516_v59, %v1515_v21 }
 0x675   :  { %v1523_v18 = vpack.c.bf16 %v1514_v52, %v1513_v22 }
 0x677   :  { %1811 = vmatprep.subr.bf16.mxu1 %v1523_v18 }
 0x678   :  { %1812 = vmatpush3.bf16.msra.mxu1 %v1523_v18 }
 0x679   :  { %1813 = vmatprep.subr.bf16.mxu1 %v1524_v14 }
 0x67c   :  { %1814 = vmatpush3.bf16.msra.mxu1 %v1524_v14 }
 0x67f   :  { %1816 = vmatmul.mubr.msk.bf16.vlgmr.msra.gmra.mrb[16].mxu1 %vm1551_vm2, %v1893_v5 }
 0x752   :  { %v1817_v17 = vpop.f32.mrb[16].mxu1 }
 0x753   :  { %v1592_v54 = vpop.f32.mrb[17].mxu1  ;;  %v1601_v28 = vadd.f32 %v1817_v17, %v1535_v60 }
 0x754   :  { %v1593_v58 = vadd.f32 %v1592_v54, %v1527_v49  ;;  %v1818_v27 = vpop.f32.mrb[18].mxu1 }
 0x755   :  { %v1595_v16 = vpop.f32.mrb[19].mxu1  ;;  %v1609_v41 = vadd.f32 %v1601_v28, %v2487_v24  ;;  %v1604_v43 = vadd.f32 %v1818_v27, %v1539_v38 }
 0x756   :  { %v1607_v29 = vadd.f32 %v1593_v58, %v2485_v1  ;;  %v1596_v19 = vadd.f32 %v1595_v16, %v1531_v23 }
 0x757   :  { %v1610_v48 = vadd.f32 %v1604_v43, %v2495_v32 }
 0x758   :  { %1611 = vxpose.xlu0.b32.start [1/4] (short) (narrow) %v1607_v29, 16  ;;  %v1608_v31 = vadd.f32 %v1596_v19, %v2489_v53 }
 0x75c   :  { %1612 = vxpose.xlu0.b32.cont [2/4] (short) (narrow) %v1608_v31, 16 }
 0x760   :  { %1613 = vxpose.xlu0.b32.cont [3/4] (short) (narrow) %v1609_v41, 16 }
 0x764   :  { %1614 = vxpose.xlu0.b32.end [4/4] (short) (narrow) %v1610_v48, 16 }
 0x7d8   :  { %v1627_v51 = vpop.trf.xlu0 }
 0x7d9   :  { %1643 = vst.msk [vmem:[#allocation2] sm:$0xff] %vm226_vm0, %v1627_v51 }
 0x7dc   :  { %v1628_v1 = vpop.trf.xlu0 }
 0x7dd   :  { %1644 = vst.msk [vmem:[#allocation2 + $0x8] sm:$0xff] %vm226_vm0, %v1628_v1 }
 0x7de   :  { %2011 = shalt.err (!%p2008_p4)
}
 0x7df   :  { %s2012_s23 = scalar_lea.hbm %s2598_s5, 256 }
 0x7e0   :  { %p2013_p5 = scmp.ne.s32.totalorder %s2598_s5, %s2012_s23  ;;  %p2016_p6 = scmp.lt.u32.totalorder %s2012_s23, %s2598_s5 }
 0x7e2   :  { %p2018_p7 = pnand %p2016_p6, %p2013_p5 }
 0x7e4   :  { %2021 = shalt.err (!%p2018_p7)
}
 0x7e5   :  { %s2041_s0 = smov 128   ;;  %s2042_s28 = smov 8  }
 0x7e6   :  { %1656 = dma.vmem_to_hbm [thread:$0]  %s1651_s20, 256, %s2598_s5, [#allocation3], %s2041_s0, %s2041_s0, %s2042_s28  }
 0x7e7   :  { %2022 = dma.done.wait [#allocation3], 256  }
 0x7e8   :  { %2023 = vsyncadd [#allocation3], 4294967040 }
 0x7e9   :  { %1660 = vsyncpa [#allocation3], 1 }

</bundles_post_ra>
